<compile_context>
chip_gen: v6e
topology: v6e:2x2x1
jax: 0.10.0
libtpu: 0.0.40
codegen_flags: <defaults>
</compile_context>

<pallas_src>
import jax
import jax.numpy as jnp
from jax.experimental import pallas as pl
from jax.experimental.pallas import tpu as pltpu


# ----------------------- pltpu.roll direction probe ------------------------ #

_ROLL_SIGN = None


def _roll_sign():
    """+1 if pltpu.roll follows the jnp.roll convention (positive shift moves
    elements toward higher indices), -1 otherwise.  One-time eager probe."""
    global _ROLL_SIGN
    if _ROLL_SIGN is None:
        def probe(x_ref, o_ref):
            o_ref[...] = pltpu.roll(x_ref[...], 1, axis=1)

        x = jnp.broadcast_to(jnp.arange(128, dtype=jnp.float32), (8, 128))
        r = pl.pallas_call(
            probe, out_shape=jax.ShapeDtypeStruct((8, 128), jnp.float32))(x)
        _ROLL_SIGN = 1 if int(r[0, 0]) == 127 else -1
    return _ROLL_SIGN


# ----------------------------- Pallas kernel ------------------------------- #

def _make_conv3x3_kernel(Cin, Cout, TH, W, HB, use_lane_roll, roll_sign):
    def kernel(xm_ref, xu_ref, xd_ref, w_ref, b_ref, o_ref):
        # xm_ref: (1, Cin, TH, W)  current row tile
        # xu_ref: (1, Cin, HB, W)  neighbor block above (last row = halo row)
        # xd_ref: (1, Cin, HB, W)  neighbor block below (first row = halo row)
        # w_ref : (Cout*Cin*9,)    SMEM, fused RK flattened [co, ci, kh, kw]
        # b_ref : (Cout,)          SMEM, fused RB
        # o_ref : (1, Cout, TH, W)
        t = pl.program_id(1)
        nt = pl.num_programs(1)

        xm = xm_ref[0].astype(jnp.float32)                      # (Cin, TH, W)
        up = xu_ref[0][:, HB - 1:HB, :].astype(jnp.float32)     # (Cin, 1, W)
        dn = xd_ref[0][:, 0:1, :].astype(jnp.float32)           # (Cin, 1, W)
        # padding=1 along H: rows above tile 0 / below tile T-1 are zero.
        up = up * (t > 0).astype(jnp.float32)
        dn = dn * (t < nt - 1).astype(jnp.float32)

        if use_lane_roll:
            # Lane-aligned W: +-1 column shifts on the XLU, edge column zeroed
            # with an iota mask on the VPU select slot.  No shifted copies.
            col0 = jax.lax.broadcasted_iota(jnp.int32, (TH, W), 1) == 0
            colL = jax.lax.broadcasted_iota(jnp.int32, (TH, W), 1) == W - 1

            def tap_w(P, dw):                      # S[:, w] = P[:, w + dw]
                rolled = pltpu.roll(P, (-dw * roll_sign) % W, axis=1)
                if dw < 0:
                    return jnp.where(col0, 0.0, rolled)
                return jnp.where(colL, 0.0, rolled)
        else:
            # Small / unaligned W (toy shapes): explicit zero-column splice.
            zcol = jnp.zeros((TH, 1), jnp.float32)

            def tap_w(P, dw):
                if dw < 0:
                    return jnp.concatenate([zcol, P[:, :W - 1]], axis=1)
                return jnp.concatenate([P[:, 1:], zcol], axis=1)

        accs = [jnp.full((TH, W), b_ref[co], jnp.float32) for co in range(Cout)]

        for ci in range(Cin):
            xc = xm[ci]                                          # (TH, W)
            # kh-shifted planes: splice the halo row in directly.
            s_up = jnp.concatenate([up[ci], xc[:TH - 1, :]], axis=0)  # x[r-1]
            s_dn = jnp.concatenate([xc[1:, :], dn[ci]], axis=0)       # x[r+1]
            for kh, P in ((0, s_up), (1, xc), (2, s_dn)):
                left = tap_w(P, -1)      # x[., w-1]  -> kernel tap kw=0
                right = tap_w(P, +1)     # x[., w+1]  -> kernel tap kw=2
                for co in range(Cout):
                    wb = ((co * Cin + ci) * 3 + kh) * 3
                    accs[co] = (accs[co]
                                + w_ref[wb + 0] * left
                                + w_ref[wb + 1] * P
                                + w_ref[wb + 2] * right)

        for co in range(Cout):
            o_ref[0, co] = accs[co].astype(o_ref.dtype)

    return kernel


def _pick_tile_h(H, W, Cin, Cout, budget_bytes=12 * 1024 * 1024):
    """Largest multiple-of-8 row tile dividing H whose per-step footprint
    (double-buffered in/out blocks + f32 working planes) stays under budget."""
    if H % 8 != 0:
        return H
    per_row = 4 * W * (3 * Cin + 3 * Cout + 4)
    max_th = max(8, (budget_bytes // per_row) // 8 * 8)
    best, th = 8, 8
    while th <= min(H, max_th):
        if H % th == 0:
            best = th
        th += 8
    return best


def conv3x3_pallas(x, rk, rb, tile_h=None):
    """out = F.conv2d(x, rk, rb, stride=1, padding=1), NCHW layout."""
    N, Cin, H, W = x.shape
    Cout = rk.shape[0]

    if tile_h is None:
        tile_h = _pick_tile_h(H, W, Cin, Cout)
    TH = tile_h
    if H % TH != 0 or (TH % 8 != 0 and TH != H):
        TH = H                                   # safe fallback: one row tile
    T = H // TH

    use_lane_roll = (W % 128 == 0)
    roll_sign = _roll_sign() if use_lane_roll else 1

    if T > 1:
        HB = 8                                   # halo arrives as 8-row block
        R = TH // 8
        up_map = lambda n, t: (n, 0, jnp.maximum(t * R - 1, 0), 0)
        dn_map = lambda n, t: (n, 0, jnp.minimum((t + 1) * R, H // 8 - 1), 0)
    else:
        HB = TH                                  # single tile: halo unused
        up_map = lambda n, t: (n, 0, 0, 0)
        dn_map = lambda n, t: (n, 0, 0, 0)

    kernel = _make_conv3x3_kernel(Cin, Cout, TH, W, HB, use_lane_roll, roll_sign)

    w_flat = rk.astype(jnp.float32).reshape(Cout * Cin * 9)
    b = rb.astype(jnp.float32)

    return pl.pallas_call(
        kernel,
        out_shape=jax.ShapeDtypeStruct((N, Cout, H, W), x.dtype),
        grid=(N, T),
        in_specs=[
            pl.BlockSpec((1, Cin, TH, W), lambda n, t: (n, 0, t, 0)),
            pl.BlockSpec((1, Cin, HB, W), up_map),
            pl.BlockSpec((1, Cin, HB, W), dn_map),
            pl.BlockSpec(memory_space=pltpu.MemorySpace.SMEM),
            pl.BlockSpec(memory_space=pltpu.MemorySpace.SMEM),
        ],
        out_specs=pl.BlockSpec((1, Cout, TH, W), lambda n, t: (n, 0, t, 0)),
        compiler_params=pltpu.CompilerParams(
            dimension_semantics=("parallel", "parallel")),
    )(x, x, x, w_flat, b)


# ------------------------- parameter setup (glue) -------------------------- #

def _edge_mask(kind, out_planes):
    if kind == "sobelx":
        base = jnp.array([[1., 0., -1.], [2., 0., -2.], [1., 0., -1.]], jnp.float32)
    elif kind == "sobely":
        base = jnp.array([[1., 2., 1.], [0., 0., 0.], [-1., -2., -1.]], jnp.float32)
    elif kind == "laplacian":
        base = jnp.array([[0., 1., 0.], [1., -4., 1.], [0., 1., 0.]], jnp.float32)
    else:
        raise ValueError(kind)
    return jnp.broadcast_to(base, (out_planes, 1, 3, 3))


def _rep_conv1x1_conv3x3(k0, b0, k1, b1):
    # k0: (mid, in, 1, 1), b0: (mid,), k1: (out, mid, 3, 3), b1: (out,)
    RK = jnp.einsum("omhw,mi->oihw", k1, k0[:, :, 0, 0])
    RB = jnp.einsum("m,omhw->o", b0, k1) + b1
    return RK, RB


def _rep_conv1x1_edge(k0, b0, scale, bias, mask):
    # k0: (out, in, 1, 1), b0: (out,), scale: (out,1,1,1), bias: (out,)
    tmp = scale * mask                                         # (out, 1, 3, 3)
    RK = tmp * k0[:, :, 0, 0][:, :, None, None]                # (out, in, 3, 3)
    RB = b0 * tmp[:, 0].sum(axis=(1, 2)) + bias
    return RK, RB


def init_ecb_params(key, inp_planes, out_planes, depth_multiplier):
    mid_planes = int(out_planes * depth_multiplier)
    ks = jax.random.split(key, 16)
    n = lambda k, shape, s=0.1: (jax.random.normal(k, shape) * s).astype(jnp.float32)
    return {
        "k_3x3": n(ks[0], (out_planes, inp_planes, 3, 3)),
        "b_3x3": n(ks[1], (out_planes,)),
        "k0_13": n(ks[2], (mid_planes, inp_planes, 1, 1)),
        "b0_13": n(ks[3], (mid_planes,)),
        "k1_13": n(ks[4], (out_planes, mid_planes, 3, 3)),
        "b1_13": n(ks[5], (out_planes,)),
        "k0_sx": n(ks[6], (out_planes, inp_planes, 1, 1)),
        "b0_sx": n(ks[7], (out_planes,)),
        "sc_sx": n(ks[8], (out_planes, 1, 1, 1), 0.001),
        "bi_sx": n(ks[9], (out_planes,), 0.001),
        "k0_sy": n(ks[10], (out_planes, inp_planes, 1, 1)),
        "b0_sy": n(ks[11], (out_planes,)),
        "sc_sy": n(ks[12], (out_planes, 1, 1, 1), 0.001),
        "bi_sy": n(ks[13], (out_planes,), 0.001),
        "k0_lp": n(ks[14], (out_planes, inp_planes, 1, 1)),
        "b0_lp": n(ks[15], (out_planes,)),
        "sc_lp": n(jax.random.fold_in(key, 100), (out_planes, 1, 1, 1), 0.001),
        "bi_lp": n(jax.random.fold_in(key, 101), (out_planes,), 0.001),
    }


def ecb_rep_params(p, out_planes):
    K0, B0 = p["k_3x3"], p["b_3x3"]
    K1, B1 = _rep_conv1x1_conv3x3(p["k0_13"], p["b0_13"], p["k1_13"], p["b1_13"])
    K2, B2 = _rep_conv1x1_edge(p["k0_sx"], p["b0_sx"], p["sc_sx"], p["bi_sx"],
                               _edge_mask("sobelx", out_planes))
    K3, B3 = _rep_conv1x1_edge(p["k0_sy"], p["b0_sy"], p["sc_sy"], p["bi_sy"],
                               _edge_mask("sobely", out_planes))
    K4, B4 = _rep_conv1x1_edge(p["k0_lp"], p["b0_lp"], p["sc_lp"], p["bi_lp"],
                               _edge_mask("laplacian", out_planes))
    # with_idt=False, act_type='linear' -> nothing else to add
    return K0 + K1 + K2 + K3 + K4, B0 + B1 + B2 + B3 + B4


def ecb_forward(x_nchw, params, out_planes, tile_h=None):
    RK, RB = ecb_rep_params(params, out_planes)
    return conv3x3_pallas(x_nchw, RK, RB, tile_h=tile_h)


# --------------------------------- main ------------------------------------ #

if __name__ == "__main__":
    inp_planes, out_planes, depth_multiplier = 4, 4, 2.0
    key = jax.random.PRNGKey(0)
    kx, kp, kx2 = jax.random.split(key, 3)

    params = init_ecb_params(kp, inp_planes, out_planes, depth_multiplier)
    RK, RB = ecb_rep_params(params, out_planes)

    def ref_conv(x):
        return jax.lax.conv_general_dilated(
            x, RK, window_strides=(1, 1), padding=((1, 1), (1, 1)),
            dimension_numbers=("NCHW", "OIHW", "NCHW"),
        ) + RB[None, :, None, None]

    # Case 1: module-sized toy input (small-W splice path, 2 batch x 2 row
    # tiles -> exercises the cross-tile halo logic).
    x = jax.random.normal(kx, (2, inp_planes, 16, 16), dtype=jnp.float32)
    y = jax.block_until_ready(ecb_forward(x, params, out_planes, tile_h=8))
    assert y.shape == (2, out_planes, 16, 16)
    assert jnp.allclose(y, ref_conv(x), atol=1e-4, rtol=1e-4)

    # Case 2: lane-aligned width -> exercises the pltpu.roll + edge-mask path
    # (the one used for real SR frame widths), still with 2 row tiles.
    x2 = jax.random.normal(kx2, (1, inp_planes, 16, 128), dtype=jnp.float32)
    y2 = jax.block_until_ready(conv3x3_pallas(x2, RK, RB, tile_h=8))
    assert jnp.allclose(y2, ref_conv(x2), atol=1e-4, rtol=1e-4)

    print("KERNEL_OK")
</pallas_src>

<mosaic_0001>
module attributes {stable_mosaic.version = 11 : i64} {
  func.func @kernel(%arg0: i32, %arg1: i32, %arg2: memref<1x4x8x16xf32, #tpu.memory_space<vmem>>, %arg3: memref<1x4x8x16xf32, #tpu.memory_space<vmem>>, %arg4: memref<1x4x8x16xf32, #tpu.memory_space<vmem>>, %arg5: memref<144xf32, #tpu.memory_space<smem>>, %arg6: memref<4xf32, #tpu.memory_space<smem>>, %arg7: memref<1x4x8x16xf32, #tpu.memory_space<vmem>>) attributes {dimension_semantics = [#tpu.dimension_semantics<parallel>, #tpu.dimension_semantics<parallel>], iteration_bounds = array<i64: 2, 2>, scalar_prefetch = 0 : i64, scratch_operands = 0 : i64, tpu.core_type = #tpu.core_type<tc>, window_params = [{transform_indices = @transform_0, window_bounds = array<i64: 1, 4, 8, 16>}, {transform_indices = @transform_1, window_bounds = array<i64: 1, 4, 8, 16>}, {transform_indices = @transform_2, window_bounds = array<i64: 1, 4, 8, 16>}, {transform_indices = @transform_3, window_bounds = array<i64: 144>}, {transform_indices = @transform_4, window_bounds = array<i64: 4>}, {transform_indices = @transform_5, window_bounds = array<i64: 1, 4, 8, 16>}]} {
    %c0 = arith.constant 0 : index
    %c0_0 = arith.constant 0 : index
    %c0_1 = arith.constant 0 : index
    %c0_2 = arith.constant 0 : index
    %0 = vector.load %arg2[%c0, %c0_0, %c0_1, %c0_2] : memref<1x4x8x16xf32, #tpu.memory_space<vmem>>, vector<1x4x8x16xf32>
    %1 = vector.shape_cast %0 : vector<1x4x8x16xf32> to vector<4x8x16xf32>
    %c0_3 = arith.constant 0 : index
    %c0_4 = arith.constant 0 : index
    %c0_5 = arith.constant 0 : index
    %c0_6 = arith.constant 0 : index
    %2 = vector.load %arg3[%c0_3, %c0_4, %c0_5, %c0_6] : memref<1x4x8x16xf32, #tpu.memory_space<vmem>>, vector<1x4x8x16xf32>
    %3 = vector.shape_cast %2 : vector<1x4x8x16xf32> to vector<4x8x16xf32>
    %4 = vector.extract_strided_slice %3 {offsets = [0, 7, 0], sizes = [4, 1, 16], strides = [1, 1, 1]} : vector<4x8x16xf32> to vector<4x1x16xf32>
    %c0_7 = arith.constant 0 : index
    %c0_8 = arith.constant 0 : index
    %c0_9 = arith.constant 0 : index
    %c0_10 = arith.constant 0 : index
    %5 = vector.load %arg4[%c0_7, %c0_8, %c0_9, %c0_10] : memref<1x4x8x16xf32, #tpu.memory_space<vmem>>, vector<1x4x8x16xf32>
    %6 = vector.shape_cast %5 : vector<1x4x8x16xf32> to vector<4x8x16xf32>
    %7 = vector.extract_strided_slice %6 {offsets = [0, 0, 0], sizes = [4, 1, 16], strides = [1, 1, 1]} : vector<4x8x16xf32> to vector<4x1x16xf32>
    %c0_i32 = arith.constant 0 : i32
    %8 = arith.cmpi sgt, %arg1, %c0_i32 : i32
    %9 = arith.extui %8 : i1 to i32
    %10 = arith.sitofp %9 : i32 to f32
    %11 = vector.broadcast %10 : f32 to vector<4x1x16xf32>
    %12 = arith.mulf %4, %11 : vector<4x1x16xf32>
    %c1_i32 = arith.constant 1 : i32
    %13 = arith.cmpi slt, %arg1, %c1_i32 : i32
    %14 = arith.extui %13 : i1 to i32
    %15 = arith.sitofp %14 : i32 to f32
    %16 = vector.broadcast %15 : f32 to vector<4x1x16xf32>
    %17 = arith.mulf %7, %16 : vector<4x1x16xf32>
    %cst = arith.constant 0.000000e+00 : f32
    %18 = vector.broadcast %cst : f32 to vector<8x1xf32>
    %c0_11 = arith.constant 0 : index
    %19 = memref.load %arg6[%c0_11] : memref<4xf32, #tpu.memory_space<smem>>
    %20 = vector.broadcast %19 : f32 to vector<8x16xf32>
    %c1 = arith.constant 1 : index
    %21 = memref.load %arg6[%c1] : memref<4xf32, #tpu.memory_space<smem>>
    %22 = vector.broadcast %21 : f32 to vector<8x16xf32>
    %c2 = arith.constant 2 : index
    %23 = memref.load %arg6[%c2] : memref<4xf32, #tpu.memory_space<smem>>
    %24 = vector.broadcast %23 : f32 to vector<8x16xf32>
    %c3 = arith.constant 3 : index
    %25 = memref.load %arg6[%c3] : memref<4xf32, #tpu.memory_space<smem>>
    %26 = vector.broadcast %25 : f32 to vector<8x16xf32>
    %27 = vector.extract_strided_slice %1 {offsets = [0, 0, 0], sizes = [1, 8, 16], strides = [1, 1, 1]} : vector<4x8x16xf32> to vector<1x8x16xf32>
    %28 = vector.shape_cast %27 : vector<1x8x16xf32> to vector<8x16xf32>
    %29 = vector.extract_strided_slice %12 {offsets = [0, 0, 0], sizes = [1, 1, 16], strides = [1, 1, 1]} : vector<4x1x16xf32> to vector<1x1x16xf32>
    %30 = vector.shape_cast %29 : vector<1x1x16xf32> to vector<1x16xf32>
    %31 = vector.extract_strided_slice %28 {offsets = [0, 0], sizes = [7, 16], strides = [1, 1]} : vector<8x16xf32> to vector<7x16xf32>
    %32 = tpu.concatenate %30, %31 in 0 : vector<1x16xf32>, vector<7x16xf32> -> vector<8x16xf32>
    %33 = vector.extract_strided_slice %28 {offsets = [1, 0], sizes = [7, 16], strides = [1, 1]} : vector<8x16xf32> to vector<7x16xf32>
    %34 = vector.extract_strided_slice %17 {offsets = [0, 0, 0], sizes = [1, 1, 16], strides = [1, 1, 1]} : vector<4x1x16xf32> to vector<1x1x16xf32>
    %35 = vector.shape_cast %34 : vector<1x1x16xf32> to vector<1x16xf32>
    %36 = tpu.concatenate %33, %35 in 0 : vector<7x16xf32>, vector<1x16xf32> -> vector<8x16xf32>
    %37 = vector.extract_strided_slice %32 {offsets = [0, 0], sizes = [8, 15], strides = [1, 1]} : vector<8x16xf32> to vector<8x15xf32>
    %38 = tpu.concatenate %18, %37 in 1 : vector<8x1xf32>, vector<8x15xf32> -> vector<8x16xf32>
    %39 = vector.extract_strided_slice %32 {offsets = [0, 1], sizes = [8, 15], strides = [1, 1]} : vector<8x16xf32> to vector<8x15xf32>
    %40 = tpu.concatenate %39, %18 in 1 : vector<8x15xf32>, vector<8x1xf32> -> vector<8x16xf32>
    %c0_12 = arith.constant 0 : index
    %41 = memref.load %arg5[%c0_12] : memref<144xf32, #tpu.memory_space<smem>>
    %42 = vector.broadcast %41 : f32 to vector<8x16xf32>
    %43 = arith.mulf %42, %38 : vector<8x16xf32>
    %44 = arith.addf %20, %43 : vector<8x16xf32>
    %c1_13 = arith.constant 1 : index
    %45 = memref.load %arg5[%c1_13] : memref<144xf32, #tpu.memory_space<smem>>
    %46 = vector.broadcast %45 : f32 to vector<8x16xf32>
    %47 = arith.mulf %46, %32 : vector<8x16xf32>
    %48 = arith.addf %44, %47 : vector<8x16xf32>
    %c2_14 = arith.constant 2 : index
    %49 = memref.load %arg5[%c2_14] : memref<144xf32, #tpu.memory_space<smem>>
    %50 = vector.broadcast %49 : f32 to vector<8x16xf32>
    %51 = arith.mulf %50, %40 : vector<8x16xf32>
    %52 = arith.addf %48, %51 : vector<8x16xf32>
    %c36 = arith.constant 36 : index
    %53 = memref.load %arg5[%c36] : memref<144xf32, #tpu.memory_space<smem>>
    %54 = vector.broadcast %53 : f32 to vector<8x16xf32>
    %55 = arith.mulf %54, %38 : vector<8x16xf32>
    %56 = arith.addf %22, %55 : vector<8x16xf32>
    %c37 = arith.constant 37 : index
    %57 = memref.load %arg5[%c37] : memref<144xf32, #tpu.memory_space<smem>>
    %58 = vector.broadcast %57 : f32 to vector<8x16xf32>
    %59 = arith.mulf %58, %32 : vector<8x16xf32>
    %60 = arith.addf %56, %59 : vector<8x16xf32>
    %c38 = arith.constant 38 : index
    %61 = memref.load %arg5[%c38] : memref<144xf32, #tpu.memory_space<smem>>
    %62 = vector.broadcast %61 : f32 to vector<8x16xf32>
    %63 = arith.mulf %62, %40 : vector<8x16xf32>
    %64 = arith.addf %60, %63 : vector<8x16xf32>
    %c72 = arith.constant 72 : index
    %65 = memref.load %arg5[%c72] : memref<144xf32, #tpu.memory_space<smem>>
    %66 = vector.broadcast %65 : f32 to vector<8x16xf32>
    %67 = arith.mulf %66, %38 : vector<8x16xf32>
    %68 = arith.addf %24, %67 : vector<8x16xf32>
    %c73 = arith.constant 73 : index
    %69 = memref.load %arg5[%c73] : memref<144xf32, #tpu.memory_space<smem>>
    %70 = vector.broadcast %69 : f32 to vector<8x16xf32>
    %71 = arith.mulf %70, %32 : vector<8x16xf32>
    %72 = arith.addf %68, %71 : vector<8x16xf32>
    %c74 = arith.constant 74 : index
    %73 = memref.load %arg5[%c74] : memref<144xf32, #tpu.memory_space<smem>>
    %74 = vector.broadcast %73 : f32 to vector<8x16xf32>
    %75 = arith.mulf %74, %40 : vector<8x16xf32>
    %76 = arith.addf %72, %75 : vector<8x16xf32>
    %c108 = arith.constant 108 : index
    %77 = memref.load %arg5[%c108] : memref<144xf32, #tpu.memory_space<smem>>
    %78 = vector.broadcast %77 : f32 to vector<8x16xf32>
    %79 = arith.mulf %78, %38 : vector<8x16xf32>
    %80 = arith.addf %26, %79 : vector<8x16xf32>
    %c109 = arith.constant 109 : index
    %81 = memref.load %arg5[%c109] : memref<144xf32, #tpu.memory_space<smem>>
    %82 = vector.broadcast %81 : f32 to vector<8x16xf32>
    %83 = arith.mulf %82, %32 : vector<8x16xf32>
    %84 = arith.addf %80, %83 : vector<8x16xf32>
    %c110 = arith.constant 110 : index
    %85 = memref.load %arg5[%c110] : memref<144xf32, #tpu.memory_space<smem>>
    %86 = vector.broadcast %85 : f32 to vector<8x16xf32>
    %87 = arith.mulf %86, %40 : vector<8x16xf32>
    %88 = arith.addf %84, %87 : vector<8x16xf32>
    %89 = vector.extract_strided_slice %28 {offsets = [0, 0], sizes = [8, 15], strides = [1, 1]} : vector<8x16xf32> to vector<8x15xf32>
    %90 = tpu.concatenate %18, %89 in 1 : vector<8x1xf32>, vector<8x15xf32> -> vector<8x16xf32>
    %91 = vector.extract_strided_slice %28 {offsets = [0, 1], sizes = [8, 15], strides = [1, 1]} : vector<8x16xf32> to vector<8x15xf32>
    %92 = tpu.concatenate %91, %18 in 1 : vector<8x15xf32>, vector<8x1xf32> -> vector<8x16xf32>
    %c3_15 = arith.constant 3 : index
    %93 = memref.load %arg5[%c3_15] : memref<144xf32, #tpu.memory_space<smem>>
    %94 = vector.broadcast %93 : f32 to vector<8x16xf32>
    %95 = arith.mulf %94, %90 : vector<8x16xf32>
    %96 = arith.addf %52, %95 : vector<8x16xf32>
    %c4 = arith.constant 4 : index
    %97 = memref.load %arg5[%c4] : memref<144xf32, #tpu.memory_space<smem>>
    %98 = vector.broadcast %97 : f32 to vector<8x16xf32>
    %99 = arith.mulf %98, %28 : vector<8x16xf32>
    %100 = arith.addf %96, %99 : vector<8x16xf32>
    %c5 = arith.constant 5 : index
    %101 = memref.load %arg5[%c5] : memref<144xf32, #tpu.memory_space<smem>>
    %102 = vector.broadcast %101 : f32 to vector<8x16xf32>
    %103 = arith.mulf %102, %92 : vector<8x16xf32>
    %104 = arith.addf %100, %103 : vector<8x16xf32>
    %c39 = arith.constant 39 : index
    %105 = memref.load %arg5[%c39] : memref<144xf32, #tpu.memory_space<smem>>
    %106 = vector.broadcast %105 : f32 to vector<8x16xf32>
    %107 = arith.mulf %106, %90 : vector<8x16xf32>
    %108 = arith.addf %64, %107 : vector<8x16xf32>
    %c40 = arith.constant 40 : index
    %109 = memref.load %arg5[%c40] : memref<144xf32, #tpu.memory_space<smem>>
    %110 = vector.broadcast %109 : f32 to vector<8x16xf32>
    %111 = arith.mulf %110, %28 : vector<8x16xf32>
    %112 = arith.addf %108, %111 : vector<8x16xf32>
    %c41 = arith.constant 41 : index
    %113 = memref.load %arg5[%c41] : memref<144xf32, #tpu.memory_space<smem>>
    %114 = vector.broadcast %113 : f32 to vector<8x16xf32>
    %115 = arith.mulf %114, %92 : vector<8x16xf32>
    %116 = arith.addf %112, %115 : vector<8x16xf32>
    %c75 = arith.constant 75 : index
    %117 = memref.load %arg5[%c75] : memref<144xf32, #tpu.memory_space<smem>>
    %118 = vector.broadcast %117 : f32 to vector<8x16xf32>
    %119 = arith.mulf %118, %90 : vector<8x16xf32>
    %120 = arith.addf %76, %119 : vector<8x16xf32>
    %c76 = arith.constant 76 : index
    %121 = memref.load %arg5[%c76] : memref<144xf32, #tpu.memory_space<smem>>
    %122 = vector.broadcast %121 : f32 to vector<8x16xf32>
    %123 = arith.mulf %122, %28 : vector<8x16xf32>
    %124 = arith.addf %120, %123 : vector<8x16xf32>
    %c77 = arith.constant 77 : index
    %125 = memref.load %arg5[%c77] : memref<144xf32, #tpu.memory_space<smem>>
    %126 = vector.broadcast %125 : f32 to vector<8x16xf32>
    %127 = arith.mulf %126, %92 : vector<8x16xf32>
    %128 = arith.addf %124, %127 : vector<8x16xf32>
    %c111 = arith.constant 111 : index
    %129 = memref.load %arg5[%c111] : memref<144xf32, #tpu.memory_space<smem>>
    %130 = vector.broadcast %129 : f32 to vector<8x16xf32>
    %131 = arith.mulf %130, %90 : vector<8x16xf32>
    %132 = arith.addf %88, %131 : vector<8x16xf32>
    %c112 = arith.constant 112 : index
    %133 = memref.load %arg5[%c112] : memref<144xf32, #tpu.memory_space<smem>>
    %134 = vector.broadcast %133 : f32 to vector<8x16xf32>
    %135 = arith.mulf %134, %28 : vector<8x16xf32>
    %136 = arith.addf %132, %135 : vector<8x16xf32>
    %c113 = arith.constant 113 : index
    %137 = memref.load %arg5[%c113] : memref<144xf32, #tpu.memory_space<smem>>
    %138 = vector.broadcast %137 : f32 to vector<8x16xf32>
    %139 = arith.mulf %138, %92 : vector<8x16xf32>
    %140 = arith.addf %136, %139 : vector<8x16xf32>
    %141 = vector.extract_strided_slice %36 {offsets = [0, 0], sizes = [8, 15], strides = [1, 1]} : vector<8x16xf32> to vector<8x15xf32>
    %142 = tpu.concatenate %18, %141 in 1 : vector<8x1xf32>, vector<8x15xf32> -> vector<8x16xf32>
    %143 = vector.extract_strided_slice %36 {offsets = [0, 1], sizes = [8, 15], strides = [1, 1]} : vector<8x16xf32> to vector<8x15xf32>
    %144 = tpu.concatenate %143, %18 in 1 : vector<8x15xf32>, vector<8x1xf32> -> vector<8x16xf32>
    %c6 = arith.constant 6 : index
    %145 = memref.load %arg5[%c6] : memref<144xf32, #tpu.memory_space<smem>>
    %146 = vector.broadcast %145 : f32 to vector<8x16xf32>
    %147 = arith.mulf %146, %142 : vector<8x16xf32>
    %148 = arith.addf %104, %147 : vector<8x16xf32>
    %c7 = arith.constant 7 : index
    %149 = memref.load %arg5[%c7] : memref<144xf32, #tpu.memory_space<smem>>
    %150 = vector.broadcast %149 : f32 to vector<8x16xf32>
    %151 = arith.mulf %150, %36 : vector<8x16xf32>
    %152 = arith.addf %148, %151 : vector<8x16xf32>
    %c8 = arith.constant 8 : index
    %153 = memref.load %arg5[%c8] : memref<144xf32, #tpu.memory_space<smem>>
    %154 = vector.broadcast %153 : f32 to vector<8x16xf32>
    %155 = arith.mulf %154, %144 : vector<8x16xf32>
    %156 = arith.addf %152, %155 : vector<8x16xf32>
    %c42 = arith.constant 42 : index
    %157 = memref.load %arg5[%c42] : memref<144xf32, #tpu.memory_space<smem>>
    %158 = vector.broadcast %157 : f32 to vector<8x16xf32>
    %159 = arith.mulf %158, %142 : vector<8x16xf32>
    %160 = arith.addf %116, %159 : vector<8x16xf32>
    %c43 = arith.constant 43 : index
    %161 = memref.load %arg5[%c43] : memref<144xf32, #tpu.memory_space<smem>>
    %162 = vector.broadcast %161 : f32 to vector<8x16xf32>
    %163 = arith.mulf %162, %36 : vector<8x16xf32>
    %164 = arith.addf %160, %163 : vector<8x16xf32>
    %c44 = arith.constant 44 : index
    %165 = memref.load %arg5[%c44] : memref<144xf32, #tpu.memory_space<smem>>
    %166 = vector.broadcast %165 : f32 to vector<8x16xf32>
    %167 = arith.mulf %166, %144 : vector<8x16xf32>
    %168 = arith.addf %164, %167 : vector<8x16xf32>
    %c78 = arith.constant 78 : index
    %169 = memref.load %arg5[%c78] : memref<144xf32, #tpu.memory_space<smem>>
    %170 = vector.broadcast %169 : f32 to vector<8x16xf32>
    %171 = arith.mulf %170, %142 : vector<8x16xf32>
    %172 = arith.addf %128, %171 : vector<8x16xf32>
    %c79 = arith.constant 79 : index
    %173 = memref.load %arg5[%c79] : memref<144xf32, #tpu.memory_space<smem>>
    %174 = vector.broadcast %173 : f32 to vector<8x16xf32>
    %175 = arith.mulf %174, %36 : vector<8x16xf32>
    %176 = arith.addf %172, %175 : vector<8x16xf32>
    %c80 = arith.constant 80 : index
    %177 = memref.load %arg5[%c80] : memref<144xf32, #tpu.memory_space<smem>>
    %178 = vector.broadcast %177 : f32 to vector<8x16xf32>
    %179 = arith.mulf %178, %144 : vector<8x16xf32>
    %180 = arith.addf %176, %179 : vector<8x16xf32>
    %c114 = arith.constant 114 : index
    %181 = memref.load %arg5[%c114] : memref<144xf32, #tpu.memory_space<smem>>
    %182 = vector.broadcast %181 : f32 to vector<8x16xf32>
    %183 = arith.mulf %182, %142 : vector<8x16xf32>
    %184 = arith.addf %140, %183 : vector<8x16xf32>
    %c115 = arith.constant 115 : index
    %185 = memref.load %arg5[%c115] : memref<144xf32, #tpu.memory_space<smem>>
    %186 = vector.broadcast %185 : f32 to vector<8x16xf32>
    %187 = arith.mulf %186, %36 : vector<8x16xf32>
    %188 = arith.addf %184, %187 : vector<8x16xf32>
    %c116 = arith.constant 116 : index
    %189 = memref.load %arg5[%c116] : memref<144xf32, #tpu.memory_space<smem>>
    %190 = vector.broadcast %189 : f32 to vector<8x16xf32>
    %191 = arith.mulf %190, %144 : vector<8x16xf32>
    %192 = arith.addf %188, %191 : vector<8x16xf32>
    %193 = vector.extract_strided_slice %1 {offsets = [1, 0, 0], sizes = [1, 8, 16], strides = [1, 1, 1]} : vector<4x8x16xf32> to vector<1x8x16xf32>
    %194 = vector.shape_cast %193 : vector<1x8x16xf32> to vector<8x16xf32>
    %195 = vector.extract_strided_slice %12 {offsets = [1, 0, 0], sizes = [1, 1, 16], strides = [1, 1, 1]} : vector<4x1x16xf32> to vector<1x1x16xf32>
    %196 = vector.shape_cast %195 : vector<1x1x16xf32> to vector<1x16xf32>
    %197 = vector.extract_strided_slice %194 {offsets = [0, 0], sizes = [7, 16], strides = [1, 1]} : vector<8x16xf32> to vector<7x16xf32>
    %198 = tpu.concatenate %196, %197 in 0 : vector<1x16xf32>, vector<7x16xf32> -> vector<8x16xf32>
    %199 = vector.extract_strided_slice %194 {offsets = [1, 0], sizes = [7, 16], strides = [1, 1]} : vector<8x16xf32> to vector<7x16xf32>
    %200 = vector.extract_strided_slice %17 {offsets = [1, 0, 0], sizes = [1, 1, 16], strides = [1, 1, 1]} : vector<4x1x16xf32> to vector<1x1x16xf32>
    %201 = vector.shape_cast %200 : vector<1x1x16xf32> to vector<1x16xf32>
    %202 = tpu.concatenate %199, %201 in 0 : vector<7x16xf32>, vector<1x16xf32> -> vector<8x16xf32>
    %203 = vector.extract_strided_slice %198 {offsets = [0, 0], sizes = [8, 15], strides = [1, 1]} : vector<8x16xf32> to vector<8x15xf32>
    %204 = tpu.concatenate %18, %203 in 1 : vector<8x1xf32>, vector<8x15xf32> -> vector<8x16xf32>
    %205 = vector.extract_strided_slice %198 {offsets = [0, 1], sizes = [8, 15], strides = [1, 1]} : vector<8x16xf32> to vector<8x15xf32>
    %206 = tpu.concatenate %205, %18 in 1 : vector<8x15xf32>, vector<8x1xf32> -> vector<8x16xf32>
    %c9 = arith.constant 9 : index
    %207 = memref.load %arg5[%c9] : memref<144xf32, #tpu.memory_space<smem>>
    %208 = vector.broadcast %207 : f32 to vector<8x16xf32>
    %209 = arith.mulf %208, %204 : vector<8x16xf32>
    %210 = arith.addf %156, %209 : vector<8x16xf32>
    %c10 = arith.constant 10 : index
    %211 = memref.load %arg5[%c10] : memref<144xf32, #tpu.memory_space<smem>>
    %212 = vector.broadcast %211 : f32 to vector<8x16xf32>
    %213 = arith.mulf %212, %198 : vector<8x16xf32>
    %214 = arith.addf %210, %213 : vector<8x16xf32>
    %c11 = arith.constant 11 : index
    %215 = memref.load %arg5[%c11] : memref<144xf32, #tpu.memory_space<smem>>
    %216 = vector.broadcast %215 : f32 to vector<8x16xf32>
    %217 = arith.mulf %216, %206 : vector<8x16xf32>
    %218 = arith.addf %214, %217 : vector<8x16xf32>
    %c45 = arith.constant 45 : index
    %219 = memref.load %arg5[%c45] : memref<144xf32, #tpu.memory_space<smem>>
    %220 = vector.broadcast %219 : f32 to vector<8x16xf32>
    %221 = arith.mulf %220, %204 : vector<8x16xf32>
    %222 = arith.addf %168, %221 : vector<8x16xf32>
    %c46 = arith.constant 46 : index
    %223 = memref.load %arg5[%c46] : memref<144xf32, #tpu.memory_space<smem>>
    %224 = vector.broadcast %223 : f32 to vector<8x16xf32>
    %225 = arith.mulf %224, %198 : vector<8x16xf32>
    %226 = arith.addf %222, %225 : vector<8x16xf32>
    %c47 = arith.constant 47 : index
    %227 = memref.load %arg5[%c47] : memref<144xf32, #tpu.memory_space<smem>>
    %228 = vector.broadcast %227 : f32 to vector<8x16xf32>
    %229 = arith.mulf %228, %206 : vector<8x16xf32>
    %230 = arith.addf %226, %229 : vector<8x16xf32>
    %c81 = arith.constant 81 : index
    %231 = memref.load %arg5[%c81] : memref<144xf32, #tpu.memory_space<smem>>
    %232 = vector.broadcast %231 : f32 to vector<8x16xf32>
    %233 = arith.mulf %232, %204 : vector<8x16xf32>
    %234 = arith.addf %180, %233 : vector<8x16xf32>
    %c82 = arith.constant 82 : index
    %235 = memref.load %arg5[%c82] : memref<144xf32, #tpu.memory_space<smem>>
    %236 = vector.broadcast %235 : f32 to vector<8x16xf32>
    %237 = arith.mulf %236, %198 : vector<8x16xf32>
    %238 = arith.addf %234, %237 : vector<8x16xf32>
    %c83 = arith.constant 83 : index
    %239 = memref.load %arg5[%c83] : memref<144xf32, #tpu.memory_space<smem>>
    %240 = vector.broadcast %239 : f32 to vector<8x16xf32>
    %241 = arith.mulf %240, %206 : vector<8x16xf32>
    %242 = arith.addf %238, %241 : vector<8x16xf32>
    %c117 = arith.constant 117 : index
    %243 = memref.load %arg5[%c117] : memref<144xf32, #tpu.memory_space<smem>>
    %244 = vector.broadcast %243 : f32 to vector<8x16xf32>
    %245 = arith.mulf %244, %204 : vector<8x16xf32>
    %246 = arith.addf %192, %245 : vector<8x16xf32>
    %c118 = arith.constant 118 : index
    %247 = memref.load %arg5[%c118] : memref<144xf32, #tpu.memory_space<smem>>
    %248 = vector.broadcast %247 : f32 to vector<8x16xf32>
    %249 = arith.mulf %248, %198 : vector<8x16xf32>
    %250 = arith.addf %246, %249 : vector<8x16xf32>
    %c119 = arith.constant 119 : index
    %251 = memref.load %arg5[%c119] : memref<144xf32, #tpu.memory_space<smem>>
    %252 = vector.broadcast %251 : f32 to vector<8x16xf32>
    %253 = arith.mulf %252, %206 : vector<8x16xf32>
    %254 = arith.addf %250, %253 : vector<8x16xf32>
    %255 = vector.extract_strided_slice %194 {offsets = [0, 0], sizes = [8, 15], strides = [1, 1]} : vector<8x16xf32> to vector<8x15xf32>
    %256 = tpu.concatenate %18, %255 in 1 : vector<8x1xf32>, vector<8x15xf32> -> vector<8x16xf32>
    %257 = vector.extract_strided_slice %194 {offsets = [0, 1], sizes = [8, 15], strides = [1, 1]} : vector<8x16xf32> to vector<8x15xf32>
    %258 = tpu.concatenate %257, %18 in 1 : vector<8x15xf32>, vector<8x1xf32> -> vector<8x16xf32>
    %c12 = arith.constant 12 : index
    %259 = memref.load %arg5[%c12] : memref<144xf32, #tpu.memory_space<smem>>
    %260 = vector.broadcast %259 : f32 to vector<8x16xf32>
    %261 = arith.mulf %260, %256 : vector<8x16xf32>
    %262 = arith.addf %218, %261 : vector<8x16xf32>
    %c13 = arith.constant 13 : index
    %263 = memref.load %arg5[%c13] : memref<144xf32, #tpu.memory_space<smem>>
    %264 = vector.broadcast %263 : f32 to vector<8x16xf32>
    %265 = arith.mulf %264, %194 : vector<8x16xf32>
    %266 = arith.addf %262, %265 : vector<8x16xf32>
    %c14 = arith.constant 14 : index
    %267 = memref.load %arg5[%c14] : memref<144xf32, #tpu.memory_space<smem>>
    %268 = vector.broadcast %267 : f32 to vector<8x16xf32>
    %269 = arith.mulf %268, %258 : vector<8x16xf32>
    %270 = arith.addf %266, %269 : vector<8x16xf32>
    %c48 = arith.constant 48 : index
    %271 = memref.load %arg5[%c48] : memref<144xf32, #tpu.memory_space<smem>>
    %272 = vector.broadcast %271 : f32 to vector<8x16xf32>
    %273 = arith.mulf %272, %256 : vector<8x16xf32>
    %274 = arith.addf %230, %273 : vector<8x16xf32>
    %c49 = arith.constant 49 : index
    %275 = memref.load %arg5[%c49] : memref<144xf32, #tpu.memory_space<smem>>
    %276 = vector.broadcast %275 : f32 to vector<8x16xf32>
    %277 = arith.mulf %276, %194 : vector<8x16xf32>
    %278 = arith.addf %274, %277 : vector<8x16xf32>
    %c50 = arith.constant 50 : index
    %279 = memref.load %arg5[%c50] : memref<144xf32, #tpu.memory_space<smem>>
    %280 = vector.broadcast %279 : f32 to vector<8x16xf32>
    %281 = arith.mulf %280, %258 : vector<8x16xf32>
    %282 = arith.addf %278, %281 : vector<8x16xf32>
    %c84 = arith.constant 84 : index
    %283 = memref.load %arg5[%c84] : memref<144xf32, #tpu.memory_space<smem>>
    %284 = vector.broadcast %283 : f32 to vector<8x16xf32>
    %285 = arith.mulf %284, %256 : vector<8x16xf32>
    %286 = arith.addf %242, %285 : vector<8x16xf32>
    %c85 = arith.constant 85 : index
    %287 = memref.load %arg5[%c85] : memref<144xf32, #tpu.memory_space<smem>>
    %288 = vector.broadcast %287 : f32 to vector<8x16xf32>
    %289 = arith.mulf %288, %194 : vector<8x16xf32>
    %290 = arith.addf %286, %289 : vector<8x16xf32>
    %c86 = arith.constant 86 : index
    %291 = memref.load %arg5[%c86] : memref<144xf32, #tpu.memory_space<smem>>
    %292 = vector.broadcast %291 : f32 to vector<8x16xf32>
    %293 = arith.mulf %292, %258 : vector<8x16xf32>
    %294 = arith.addf %290, %293 : vector<8x16xf32>
    %c120 = arith.constant 120 : index
    %295 = memref.load %arg5[%c120] : memref<144xf32, #tpu.memory_space<smem>>
    %296 = vector.broadcast %295 : f32 to vector<8x16xf32>
    %297 = arith.mulf %296, %256 : vector<8x16xf32>
    %298 = arith.addf %254, %297 : vector<8x16xf32>
    %c121 = arith.constant 121 : index
    %299 = memref.load %arg5[%c121] : memref<144xf32, #tpu.memory_space<smem>>
    %300 = vector.broadcast %299 : f32 to vector<8x16xf32>
    %301 = arith.mulf %300, %194 : vector<8x16xf32>
    %302 = arith.addf %298, %301 : vector<8x16xf32>
    %c122 = arith.constant 122 : index
    %303 = memref.load %arg5[%c122] : memref<144xf32, #tpu.memory_space<smem>>
    %304 = vector.broadcast %303 : f32 to vector<8x16xf32>
    %305 = arith.mulf %304, %258 : vector<8x16xf32>
    %306 = arith.addf %302, %305 : vector<8x16xf32>
    %307 = vector.extract_strided_slice %202 {offsets = [0, 0], sizes = [8, 15], strides = [1, 1]} : vector<8x16xf32> to vector<8x15xf32>
    %308 = tpu.concatenate %18, %307 in 1 : vector<8x1xf32>, vector<8x15xf32> -> vector<8x16xf32>
    %309 = vector.extract_strided_slice %202 {offsets = [0, 1], sizes = [8, 15], strides = [1, 1]} : vector<8x16xf32> to vector<8x15xf32>
    %310 = tpu.concatenate %309, %18 in 1 : vector<8x15xf32>, vector<8x1xf32> -> vector<8x16xf32>
    %c15 = arith.constant 15 : index
    %311 = memref.load %arg5[%c15] : memref<144xf32, #tpu.memory_space<smem>>
    %312 = vector.broadcast %311 : f32 to vector<8x16xf32>
    %313 = arith.mulf %312, %308 : vector<8x16xf32>
    %314 = arith.addf %270, %313 : vector<8x16xf32>
    %c16 = arith.constant 16 : index
    %315 = memref.load %arg5[%c16] : memref<144xf32, #tpu.memory_space<smem>>
    %316 = vector.broadcast %315 : f32 to vector<8x16xf32>
    %317 = arith.mulf %316, %202 : vector<8x16xf32>
    %318 = arith.addf %314, %317 : vector<8x16xf32>
    %c17 = arith.constant 17 : index
    %319 = memref.load %arg5[%c17] : memref<144xf32, #tpu.memory_space<smem>>
    %320 = vector.broadcast %319 : f32 to vector<8x16xf32>
    %321 = arith.mulf %320, %310 : vector<8x16xf32>
    %322 = arith.addf %318, %321 : vector<8x16xf32>
    %c51 = arith.constant 51 : index
    %323 = memref.load %arg5[%c51] : memref<144xf32, #tpu.memory_space<smem>>
    %324 = vector.broadcast %323 : f32 to vector<8x16xf32>
    %325 = arith.mulf %324, %308 : vector<8x16xf32>
    %326 = arith.addf %282, %325 : vector<8x16xf32>
    %c52 = arith.constant 52 : index
    %327 = memref.load %arg5[%c52] : memref<144xf32, #tpu.memory_space<smem>>
    %328 = vector.broadcast %327 : f32 to vector<8x16xf32>
    %329 = arith.mulf %328, %202 : vector<8x16xf32>
    %330 = arith.addf %326, %329 : vector<8x16xf32>
    %c53 = arith.constant 53 : index
    %331 = memref.load %arg5[%c53] : memref<144xf32, #tpu.memory_space<smem>>
    %332 = vector.broadcast %331 : f32 to vector<8x16xf32>
    %333 = arith.mulf %332, %310 : vector<8x16xf32>
    %334 = arith.addf %330, %333 : vector<8x16xf32>
    %c87 = arith.constant 87 : index
    %335 = memref.load %arg5[%c87] : memref<144xf32, #tpu.memory_space<smem>>
    %336 = vector.broadcast %335 : f32 to vector<8x16xf32>
    %337 = arith.mulf %336, %308 : vector<8x16xf32>
    %338 = arith.addf %294, %337 : vector<8x16xf32>
    %c88 = arith.constant 88 : index
    %339 = memref.load %arg5[%c88] : memref<144xf32, #tpu.memory_space<smem>>
    %340 = vector.broadcast %339 : f32 to vector<8x16xf32>
    %341 = arith.mulf %340, %202 : vector<8x16xf32>
    %342 = arith.addf %338, %341 : vector<8x16xf32>
    %c89 = arith.constant 89 : index
    %343 = memref.load %arg5[%c89] : memref<144xf32, #tpu.memory_space<smem>>
    %344 = vector.broadcast %343 : f32 to vector<8x16xf32>
    %345 = arith.mulf %344, %310 : vector<8x16xf32>
    %346 = arith.addf %342, %345 : vector<8x16xf32>
    %c123 = arith.constant 123 : index
    %347 = memref.load %arg5[%c123] : memref<144xf32, #tpu.memory_space<smem>>
    %348 = vector.broadcast %347 : f32 to vector<8x16xf32>
    %349 = arith.mulf %348, %308 : vector<8x16xf32>
    %350 = arith.addf %306, %349 : vector<8x16xf32>
    %c124 = arith.constant 124 : index
    %351 = memref.load %arg5[%c124] : memref<144xf32, #tpu.memory_space<smem>>
    %352 = vector.broadcast %351 : f32 to vector<8x16xf32>
    %353 = arith.mulf %352, %202 : vector<8x16xf32>
    %354 = arith.addf %350, %353 : vector<8x16xf32>
    %c125 = arith.constant 125 : index
    %355 = memref.load %arg5[%c125] : memref<144xf32, #tpu.memory_space<smem>>
    %356 = vector.broadcast %355 : f32 to vector<8x16xf32>
    %357 = arith.mulf %356, %310 : vector<8x16xf32>
    %358 = arith.addf %354, %357 : vector<8x16xf32>
    %359 = vector.extract_strided_slice %1 {offsets = [2, 0, 0], sizes = [1, 8, 16], strides = [1, 1, 1]} : vector<4x8x16xf32> to vector<1x8x16xf32>
    %360 = vector.shape_cast %359 : vector<1x8x16xf32> to vector<8x16xf32>
    %361 = vector.extract_strided_slice %12 {offsets = [2, 0, 0], sizes = [1, 1, 16], strides = [1, 1, 1]} : vector<4x1x16xf32> to vector<1x1x16xf32>
    %362 = vector.shape_cast %361 : vector<1x1x16xf32> to vector<1x16xf32>
    %363 = vector.extract_strided_slice %360 {offsets = [0, 0], sizes = [7, 16], strides = [1, 1]} : vector<8x16xf32> to vector<7x16xf32>
    %364 = tpu.concatenate %362, %363 in 0 : vector<1x16xf32>, vector<7x16xf32> -> vector<8x16xf32>
    %365 = vector.extract_strided_slice %360 {offsets = [1, 0], sizes = [7, 16], strides = [1, 1]} : vector<8x16xf32> to vector<7x16xf32>
    %366 = vector.extract_strided_slice %17 {offsets = [2, 0, 0], sizes = [1, 1, 16], strides = [1, 1, 1]} : vector<4x1x16xf32> to vector<1x1x16xf32>
    %367 = vector.shape_cast %366 : vector<1x1x16xf32> to vector<1x16xf32>
    %368 = tpu.concatenate %365, %367 in 0 : vector<7x16xf32>, vector<1x16xf32> -> vector<8x16xf32>
    %369 = vector.extract_strided_slice %364 {offsets = [0, 0], sizes = [8, 15], strides = [1, 1]} : vector<8x16xf32> to vector<8x15xf32>
    %370 = tpu.concatenate %18, %369 in 1 : vector<8x1xf32>, vector<8x15xf32> -> vector<8x16xf32>
    %371 = vector.extract_strided_slice %364 {offsets = [0, 1], sizes = [8, 15], strides = [1, 1]} : vector<8x16xf32> to vector<8x15xf32>
    %372 = tpu.concatenate %371, %18 in 1 : vector<8x15xf32>, vector<8x1xf32> -> vector<8x16xf32>
    %c18 = arith.constant 18 : index
    %373 = memref.load %arg5[%c18] : memref<144xf32, #tpu.memory_space<smem>>
    %374 = vector.broadcast %373 : f32 to vector<8x16xf32>
    %375 = arith.mulf %374, %370 : vector<8x16xf32>
    %376 = arith.addf %322, %375 : vector<8x16xf32>
    %c19 = arith.constant 19 : index
    %377 = memref.load %arg5[%c19] : memref<144xf32, #tpu.memory_space<smem>>
    %378 = vector.broadcast %377 : f32 to vector<8x16xf32>
    %379 = arith.mulf %378, %364 : vector<8x16xf32>
    %380 = arith.addf %376, %379 : vector<8x16xf32>
    %c20 = arith.constant 20 : index
    %381 = memref.load %arg5[%c20] : memref<144xf32, #tpu.memory_space<smem>>
    %382 = vector.broadcast %381 : f32 to vector<8x16xf32>
    %383 = arith.mulf %382, %372 : vector<8x16xf32>
    %384 = arith.addf %380, %383 : vector<8x16xf32>
    %c54 = arith.constant 54 : index
    %385 = memref.load %arg5[%c54] : memref<144xf32, #tpu.memory_space<smem>>
    %386 = vector.broadcast %385 : f32 to vector<8x16xf32>
    %387 = arith.mulf %386, %370 : vector<8x16xf32>
    %388 = arith.addf %334, %387 : vector<8x16xf32>
    %c55 = arith.constant 55 : index
    %389 = memref.load %arg5[%c55] : memref<144xf32, #tpu.memory_space<smem>>
    %390 = vector.broadcast %389 : f32 to vector<8x16xf32>
    %391 = arith.mulf %390, %364 : vector<8x16xf32>
    %392 = arith.addf %388, %391 : vector<8x16xf32>
    %c56 = arith.constant 56 : index
    %393 = memref.load %arg5[%c56] : memref<144xf32, #tpu.memory_space<smem>>
    %394 = vector.broadcast %393 : f32 to vector<8x16xf32>
    %395 = arith.mulf %394, %372 : vector<8x16xf32>
    %396 = arith.addf %392, %395 : vector<8x16xf32>
    %c90 = arith.constant 90 : index
    %397 = memref.load %arg5[%c90] : memref<144xf32, #tpu.memory_space<smem>>
    %398 = vector.broadcast %397 : f32 to vector<8x16xf32>
    %399 = arith.mulf %398, %370 : vector<8x16xf32>
    %400 = arith.addf %346, %399 : vector<8x16xf32>
    %c91 = arith.constant 91 : index
    %401 = memref.load %arg5[%c91] : memref<144xf32, #tpu.memory_space<smem>>
    %402 = vector.broadcast %401 : f32 to vector<8x16xf32>
    %403 = arith.mulf %402, %364 : vector<8x16xf32>
    %404 = arith.addf %400, %403 : vector<8x16xf32>
    %c92 = arith.constant 92 : index
    %405 = memref.load %arg5[%c92] : memref<144xf32, #tpu.memory_space<smem>>
    %406 = vector.broadcast %405 : f32 to vector<8x16xf32>
    %407 = arith.mulf %406, %372 : vector<8x16xf32>
    %408 = arith.addf %404, %407 : vector<8x16xf32>
    %c126 = arith.constant 126 : index
    %409 = memref.load %arg5[%c126] : memref<144xf32, #tpu.memory_space<smem>>
    %410 = vector.broadcast %409 : f32 to vector<8x16xf32>
    %411 = arith.mulf %410, %370 : vector<8x16xf32>
    %412 = arith.addf %358, %411 : vector<8x16xf32>
    %c127 = arith.constant 127 : index
    %413 = memref.load %arg5[%c127] : memref<144xf32, #tpu.memory_space<smem>>
    %414 = vector.broadcast %413 : f32 to vector<8x16xf32>
    %415 = arith.mulf %414, %364 : vector<8x16xf32>
    %416 = arith.addf %412, %415 : vector<8x16xf32>
    %c128 = arith.constant 128 : index
    %417 = memref.load %arg5[%c128] : memref<144xf32, #tpu.memory_space<smem>>
    %418 = vector.broadcast %417 : f32 to vector<8x16xf32>
    %419 = arith.mulf %418, %372 : vector<8x16xf32>
    %420 = arith.addf %416, %419 : vector<8x16xf32>
    %421 = vector.extract_strided_slice %360 {offsets = [0, 0], sizes = [8, 15], strides = [1, 1]} : vector<8x16xf32> to vector<8x15xf32>
    %422 = tpu.concatenate %18, %421 in 1 : vector<8x1xf32>, vector<8x15xf32> -> vector<8x16xf32>
    %423 = vector.extract_strided_slice %360 {offsets = [0, 1], sizes = [8, 15], strides = [1, 1]} : vector<8x16xf32> to vector<8x15xf32>
    %424 = tpu.concatenate %423, %18 in 1 : vector<8x15xf32>, vector<8x1xf32> -> vector<8x16xf32>
    %c21 = arith.constant 21 : index
    %425 = memref.load %arg5[%c21] : memref<144xf32, #tpu.memory_space<smem>>
    %426 = vector.broadcast %425 : f32 to vector<8x16xf32>
    %427 = arith.mulf %426, %422 : vector<8x16xf32>
    %428 = arith.addf %384, %427 : vector<8x16xf32>
    %c22 = arith.constant 22 : index
    %429 = memref.load %arg5[%c22] : memref<144xf32, #tpu.memory_space<smem>>
    %430 = vector.broadcast %429 : f32 to vector<8x16xf32>
    %431 = arith.mulf %430, %360 : vector<8x16xf32>
    %432 = arith.addf %428, %431 : vector<8x16xf32>
    %c23 = arith.constant 23 : index
    %433 = memref.load %arg5[%c23] : memref<144xf32, #tpu.memory_space<smem>>
    %434 = vector.broadcast %433 : f32 to vector<8x16xf32>
    %435 = arith.mulf %434, %424 : vector<8x16xf32>
    %436 = arith.addf %432, %435 : vector<8x16xf32>
    %c57 = arith.constant 57 : index
    %437 = memref.load %arg5[%c57] : memref<144xf32, #tpu.memory_space<smem>>
    %438 = vector.broadcast %437 : f32 to vector<8x16xf32>
    %439 = arith.mulf %438, %422 : vector<8x16xf32>
    %440 = arith.addf %396, %439 : vector<8x16xf32>
    %c58 = arith.constant 58 : index
    %441 = memref.load %arg5[%c58] : memref<144xf32, #tpu.memory_space<smem>>
    %442 = vector.broadcast %441 : f32 to vector<8x16xf32>
    %443 = arith.mulf %442, %360 : vector<8x16xf32>
    %444 = arith.addf %440, %443 : vector<8x16xf32>
    %c59 = arith.constant 59 : index
    %445 = memref.load %arg5[%c59] : memref<144xf32, #tpu.memory_space<smem>>
    %446 = vector.broadcast %445 : f32 to vector<8x16xf32>
    %447 = arith.mulf %446, %424 : vector<8x16xf32>
    %448 = arith.addf %444, %447 : vector<8x16xf32>
    %c93 = arith.constant 93 : index
    %449 = memref.load %arg5[%c93] : memref<144xf32, #tpu.memory_space<smem>>
    %450 = vector.broadcast %449 : f32 to vector<8x16xf32>
    %451 = arith.mulf %450, %422 : vector<8x16xf32>
    %452 = arith.addf %408, %451 : vector<8x16xf32>
    %c94 = arith.constant 94 : index
    %453 = memref.load %arg5[%c94] : memref<144xf32, #tpu.memory_space<smem>>
    %454 = vector.broadcast %453 : f32 to vector<8x16xf32>
    %455 = arith.mulf %454, %360 : vector<8x16xf32>
    %456 = arith.addf %452, %455 : vector<8x16xf32>
    %c95 = arith.constant 95 : index
    %457 = memref.load %arg5[%c95] : memref<144xf32, #tpu.memory_space<smem>>
    %458 = vector.broadcast %457 : f32 to vector<8x16xf32>
    %459 = arith.mulf %458, %424 : vector<8x16xf32>
    %460 = arith.addf %456, %459 : vector<8x16xf32>
    %c129 = arith.constant 129 : index
    %461 = memref.load %arg5[%c129] : memref<144xf32, #tpu.memory_space<smem>>
    %462 = vector.broadcast %461 : f32 to vector<8x16xf32>
    %463 = arith.mulf %462, %422 : vector<8x16xf32>
    %464 = arith.addf %420, %463 : vector<8x16xf32>
    %c130 = arith.constant 130 : index
    %465 = memref.load %arg5[%c130] : memref<144xf32, #tpu.memory_space<smem>>
    %466 = vector.broadcast %465 : f32 to vector<8x16xf32>
    %467 = arith.mulf %466, %360 : vector<8x16xf32>
    %468 = arith.addf %464, %467 : vector<8x16xf32>
    %c131 = arith.constant 131 : index
    %469 = memref.load %arg5[%c131] : memref<144xf32, #tpu.memory_space<smem>>
    %470 = vector.broadcast %469 : f32 to vector<8x16xf32>
    %471 = arith.mulf %470, %424 : vector<8x16xf32>
    %472 = arith.addf %468, %471 : vector<8x16xf32>
    %473 = vector.extract_strided_slice %368 {offsets = [0, 0], sizes = [8, 15], strides = [1, 1]} : vector<8x16xf32> to vector<8x15xf32>
    %474 = tpu.concatenate %18, %473 in 1 : vector<8x1xf32>, vector<8x15xf32> -> vector<8x16xf32>
    %475 = vector.extract_strided_slice %368 {offsets = [0, 1], sizes = [8, 15], strides = [1, 1]} : vector<8x16xf32> to vector<8x15xf32>
    %476 = tpu.concatenate %475, %18 in 1 : vector<8x15xf32>, vector<8x1xf32> -> vector<8x16xf32>
    %c24 = arith.constant 24 : index
    %477 = memref.load %arg5[%c24] : memref<144xf32, #tpu.memory_space<smem>>
    %478 = vector.broadcast %477 : f32 to vector<8x16xf32>
    %479 = arith.mulf %478, %474 : vector<8x16xf32>
    %480 = arith.addf %436, %479 : vector<8x16xf32>
    %c25 = arith.constant 25 : index
    %481 = memref.load %arg5[%c25] : memref<144xf32, #tpu.memory_space<smem>>
    %482 = vector.broadcast %481 : f32 to vector<8x16xf32>
    %483 = arith.mulf %482, %368 : vector<8x16xf32>
    %484 = arith.addf %480, %483 : vector<8x16xf32>
    %c26 = arith.constant 26 : index
    %485 = memref.load %arg5[%c26] : memref<144xf32, #tpu.memory_space<smem>>
    %486 = vector.broadcast %485 : f32 to vector<8x16xf32>
    %487 = arith.mulf %486, %476 : vector<8x16xf32>
    %488 = arith.addf %484, %487 : vector<8x16xf32>
    %c60 = arith.constant 60 : index
    %489 = memref.load %arg5[%c60] : memref<144xf32, #tpu.memory_space<smem>>
    %490 = vector.broadcast %489 : f32 to vector<8x16xf32>
    %491 = arith.mulf %490, %474 : vector<8x16xf32>
    %492 = arith.addf %448, %491 : vector<8x16xf32>
    %c61 = arith.constant 61 : index
    %493 = memref.load %arg5[%c61] : memref<144xf32, #tpu.memory_space<smem>>
    %494 = vector.broadcast %493 : f32 to vector<8x16xf32>
    %495 = arith.mulf %494, %368 : vector<8x16xf32>
    %496 = arith.addf %492, %495 : vector<8x16xf32>
    %c62 = arith.constant 62 : index
    %497 = memref.load %arg5[%c62] : memref<144xf32, #tpu.memory_space<smem>>
    %498 = vector.broadcast %497 : f32 to vector<8x16xf32>
    %499 = arith.mulf %498, %476 : vector<8x16xf32>
    %500 = arith.addf %496, %499 : vector<8x16xf32>
    %c96 = arith.constant 96 : index
    %501 = memref.load %arg5[%c96] : memref<144xf32, #tpu.memory_space<smem>>
    %502 = vector.broadcast %501 : f32 to vector<8x16xf32>
    %503 = arith.mulf %502, %474 : vector<8x16xf32>
    %504 = arith.addf %460, %503 : vector<8x16xf32>
    %c97 = arith.constant 97 : index
    %505 = memref.load %arg5[%c97] : memref<144xf32, #tpu.memory_space<smem>>
    %506 = vector.broadcast %505 : f32 to vector<8x16xf32>
    %507 = arith.mulf %506, %368 : vector<8x16xf32>
    %508 = arith.addf %504, %507 : vector<8x16xf32>
    %c98 = arith.constant 98 : index
    %509 = memref.load %arg5[%c98] : memref<144xf32, #tpu.memory_space<smem>>
    %510 = vector.broadcast %509 : f32 to vector<8x16xf32>
    %511 = arith.mulf %510, %476 : vector<8x16xf32>
    %512 = arith.addf %508, %511 : vector<8x16xf32>
    %c132 = arith.constant 132 : index
    %513 = memref.load %arg5[%c132] : memref<144xf32, #tpu.memory_space<smem>>
    %514 = vector.broadcast %513 : f32 to vector<8x16xf32>
    %515 = arith.mulf %514, %474 : vector<8x16xf32>
    %516 = arith.addf %472, %515 : vector<8x16xf32>
    %c133 = arith.constant 133 : index
    %517 = memref.load %arg5[%c133] : memref<144xf32, #tpu.memory_space<smem>>
    %518 = vector.broadcast %517 : f32 to vector<8x16xf32>
    %519 = arith.mulf %518, %368 : vector<8x16xf32>
    %520 = arith.addf %516, %519 : vector<8x16xf32>
    %c134 = arith.constant 134 : index
    %521 = memref.load %arg5[%c134] : memref<144xf32, #tpu.memory_space<smem>>
    %522 = vector.broadcast %521 : f32 to vector<8x16xf32>
    %523 = arith.mulf %522, %476 : vector<8x16xf32>
    %524 = arith.addf %520, %523 : vector<8x16xf32>
    %525 = vector.extract_strided_slice %1 {offsets = [3, 0, 0], sizes = [1, 8, 16], strides = [1, 1, 1]} : vector<4x8x16xf32> to vector<1x8x16xf32>
    %526 = vector.shape_cast %525 : vector<1x8x16xf32> to vector<8x16xf32>
    %527 = vector.extract_strided_slice %12 {offsets = [3, 0, 0], sizes = [1, 1, 16], strides = [1, 1, 1]} : vector<4x1x16xf32> to vector<1x1x16xf32>
    %528 = vector.shape_cast %527 : vector<1x1x16xf32> to vector<1x16xf32>
    %529 = vector.extract_strided_slice %526 {offsets = [0, 0], sizes = [7, 16], strides = [1, 1]} : vector<8x16xf32> to vector<7x16xf32>
    %530 = tpu.concatenate %528, %529 in 0 : vector<1x16xf32>, vector<7x16xf32> -> vector<8x16xf32>
    %531 = vector.extract_strided_slice %526 {offsets = [1, 0], sizes = [7, 16], strides = [1, 1]} : vector<8x16xf32> to vector<7x16xf32>
    %532 = vector.extract_strided_slice %17 {offsets = [3, 0, 0], sizes = [1, 1, 16], strides = [1, 1, 1]} : vector<4x1x16xf32> to vector<1x1x16xf32>
    %533 = vector.shape_cast %532 : vector<1x1x16xf32> to vector<1x16xf32>
    %534 = tpu.concatenate %531, %533 in 0 : vector<7x16xf32>, vector<1x16xf32> -> vector<8x16xf32>
    %535 = vector.extract_strided_slice %530 {offsets = [0, 0], sizes = [8, 15], strides = [1, 1]} : vector<8x16xf32> to vector<8x15xf32>
    %536 = tpu.concatenate %18, %535 in 1 : vector<8x1xf32>, vector<8x15xf32> -> vector<8x16xf32>
    %537 = vector.extract_strided_slice %530 {offsets = [0, 1], sizes = [8, 15], strides = [1, 1]} : vector<8x16xf32> to vector<8x15xf32>
    %538 = tpu.concatenate %537, %18 in 1 : vector<8x15xf32>, vector<8x1xf32> -> vector<8x16xf32>
    %c27 = arith.constant 27 : index
    %539 = memref.load %arg5[%c27] : memref<144xf32, #tpu.memory_space<smem>>
    %540 = vector.broadcast %539 : f32 to vector<8x16xf32>
    %541 = arith.mulf %540, %536 : vector<8x16xf32>
    %542 = arith.addf %488, %541 : vector<8x16xf32>
    %c28 = arith.constant 28 : index
    %543 = memref.load %arg5[%c28] : memref<144xf32, #tpu.memory_space<smem>>
    %544 = vector.broadcast %543 : f32 to vector<8x16xf32>
    %545 = arith.mulf %544, %530 : vector<8x16xf32>
    %546 = arith.addf %542, %545 : vector<8x16xf32>
    %c29 = arith.constant 29 : index
    %547 = memref.load %arg5[%c29] : memref<144xf32, #tpu.memory_space<smem>>
    %548 = vector.broadcast %547 : f32 to vector<8x16xf32>
    %549 = arith.mulf %548, %538 : vector<8x16xf32>
    %550 = arith.addf %546, %549 : vector<8x16xf32>
    %c63 = arith.constant 63 : index
    %551 = memref.load %arg5[%c63] : memref<144xf32, #tpu.memory_space<smem>>
    %552 = vector.broadcast %551 : f32 to vector<8x16xf32>
    %553 = arith.mulf %552, %536 : vector<8x16xf32>
    %554 = arith.addf %500, %553 : vector<8x16xf32>
    %c64 = arith.constant 64 : index
    %555 = memref.load %arg5[%c64] : memref<144xf32, #tpu.memory_space<smem>>
    %556 = vector.broadcast %555 : f32 to vector<8x16xf32>
    %557 = arith.mulf %556, %530 : vector<8x16xf32>
    %558 = arith.addf %554, %557 : vector<8x16xf32>
    %c65 = arith.constant 65 : index
    %559 = memref.load %arg5[%c65] : memref<144xf32, #tpu.memory_space<smem>>
    %560 = vector.broadcast %559 : f32 to vector<8x16xf32>
    %561 = arith.mulf %560, %538 : vector<8x16xf32>
    %562 = arith.addf %558, %561 : vector<8x16xf32>
    %c99 = arith.constant 99 : index
    %563 = memref.load %arg5[%c99] : memref<144xf32, #tpu.memory_space<smem>>
    %564 = vector.broadcast %563 : f32 to vector<8x16xf32>
    %565 = arith.mulf %564, %536 : vector<8x16xf32>
    %566 = arith.addf %512, %565 : vector<8x16xf32>
    %c100 = arith.constant 100 : index
    %567 = memref.load %arg5[%c100] : memref<144xf32, #tpu.memory_space<smem>>
    %568 = vector.broadcast %567 : f32 to vector<8x16xf32>
    %569 = arith.mulf %568, %530 : vector<8x16xf32>
    %570 = arith.addf %566, %569 : vector<8x16xf32>
    %c101 = arith.constant 101 : index
    %571 = memref.load %arg5[%c101] : memref<144xf32, #tpu.memory_space<smem>>
    %572 = vector.broadcast %571 : f32 to vector<8x16xf32>
    %573 = arith.mulf %572, %538 : vector<8x16xf32>
    %574 = arith.addf %570, %573 : vector<8x16xf32>
    %c135 = arith.constant 135 : index
    %575 = memref.load %arg5[%c135] : memref<144xf32, #tpu.memory_space<smem>>
    %576 = vector.broadcast %575 : f32 to vector<8x16xf32>
    %577 = arith.mulf %576, %536 : vector<8x16xf32>
    %578 = arith.addf %524, %577 : vector<8x16xf32>
    %c136 = arith.constant 136 : index
    %579 = memref.load %arg5[%c136] : memref<144xf32, #tpu.memory_space<smem>>
    %580 = vector.broadcast %579 : f32 to vector<8x16xf32>
    %581 = arith.mulf %580, %530 : vector<8x16xf32>
    %582 = arith.addf %578, %581 : vector<8x16xf32>
    %c137 = arith.constant 137 : index
    %583 = memref.load %arg5[%c137] : memref<144xf32, #tpu.memory_space<smem>>
    %584 = vector.broadcast %583 : f32 to vector<8x16xf32>
    %585 = arith.mulf %584, %538 : vector<8x16xf32>
    %586 = arith.addf %582, %585 : vector<8x16xf32>
    %587 = vector.extract_strided_slice %526 {offsets = [0, 0], sizes = [8, 15], strides = [1, 1]} : vector<8x16xf32> to vector<8x15xf32>
    %588 = tpu.concatenate %18, %587 in 1 : vector<8x1xf32>, vector<8x15xf32> -> vector<8x16xf32>
    %589 = vector.extract_strided_slice %526 {offsets = [0, 1], sizes = [8, 15], strides = [1, 1]} : vector<8x16xf32> to vector<8x15xf32>
    %590 = tpu.concatenate %589, %18 in 1 : vector<8x15xf32>, vector<8x1xf32> -> vector<8x16xf32>
    %c30 = arith.constant 30 : index
    %591 = memref.load %arg5[%c30] : memref<144xf32, #tpu.memory_space<smem>>
    %592 = vector.broadcast %591 : f32 to vector<8x16xf32>
    %593 = arith.mulf %592, %588 : vector<8x16xf32>
    %594 = arith.addf %550, %593 : vector<8x16xf32>
    %c31 = arith.constant 31 : index
    %595 = memref.load %arg5[%c31] : memref<144xf32, #tpu.memory_space<smem>>
    %596 = vector.broadcast %595 : f32 to vector<8x16xf32>
    %597 = arith.mulf %596, %526 : vector<8x16xf32>
    %598 = arith.addf %594, %597 : vector<8x16xf32>
    %c32 = arith.constant 32 : index
    %599 = memref.load %arg5[%c32] : memref<144xf32, #tpu.memory_space<smem>>
    %600 = vector.broadcast %599 : f32 to vector<8x16xf32>
    %601 = arith.mulf %600, %590 : vector<8x16xf32>
    %602 = arith.addf %598, %601 : vector<8x16xf32>
    %c66 = arith.constant 66 : index
    %603 = memref.load %arg5[%c66] : memref<144xf32, #tpu.memory_space<smem>>
    %604 = vector.broadcast %603 : f32 to vector<8x16xf32>
    %605 = arith.mulf %604, %588 : vector<8x16xf32>
    %606 = arith.addf %562, %605 : vector<8x16xf32>
    %c67 = arith.constant 67 : index
    %607 = memref.load %arg5[%c67] : memref<144xf32, #tpu.memory_space<smem>>
    %608 = vector.broadcast %607 : f32 to vector<8x16xf32>
    %609 = arith.mulf %608, %526 : vector<8x16xf32>
    %610 = arith.addf %606, %609 : vector<8x16xf32>
    %c68 = arith.constant 68 : index
    %611 = memref.load %arg5[%c68] : memref<144xf32, #tpu.memory_space<smem>>
    %612 = vector.broadcast %611 : f32 to vector<8x16xf32>
    %613 = arith.mulf %612, %590 : vector<8x16xf32>
    %614 = arith.addf %610, %613 : vector<8x16xf32>
    %c102 = arith.constant 102 : index
    %615 = memref.load %arg5[%c102] : memref<144xf32, #tpu.memory_space<smem>>
    %616 = vector.broadcast %615 : f32 to vector<8x16xf32>
    %617 = arith.mulf %616, %588 : vector<8x16xf32>
    %618 = arith.addf %574, %617 : vector<8x16xf32>
    %c103 = arith.constant 103 : index
    %619 = memref.load %arg5[%c103] : memref<144xf32, #tpu.memory_space<smem>>
    %620 = vector.broadcast %619 : f32 to vector<8x16xf32>
    %621 = arith.mulf %620, %526 : vector<8x16xf32>
    %622 = arith.addf %618, %621 : vector<8x16xf32>
    %c104 = arith.constant 104 : index
    %623 = memref.load %arg5[%c104] : memref<144xf32, #tpu.memory_space<smem>>
    %624 = vector.broadcast %623 : f32 to vector<8x16xf32>
    %625 = arith.mulf %624, %590 : vector<8x16xf32>
    %626 = arith.addf %622, %625 : vector<8x16xf32>
    %c138 = arith.constant 138 : index
    %627 = memref.load %arg5[%c138] : memref<144xf32, #tpu.memory_space<smem>>
    %628 = vector.broadcast %627 : f32 to vector<8x16xf32>
    %629 = arith.mulf %628, %588 : vector<8x16xf32>
    %630 = arith.addf %586, %629 : vector<8x16xf32>
    %c139 = arith.constant 139 : index
    %631 = memref.load %arg5[%c139] : memref<144xf32, #tpu.memory_space<smem>>
    %632 = vector.broadcast %631 : f32 to vector<8x16xf32>
    %633 = arith.mulf %632, %526 : vector<8x16xf32>
    %634 = arith.addf %630, %633 : vector<8x16xf32>
    %c140 = arith.constant 140 : index
    %635 = memref.load %arg5[%c140] : memref<144xf32, #tpu.memory_space<smem>>
    %636 = vector.broadcast %635 : f32 to vector<8x16xf32>
    %637 = arith.mulf %636, %590 : vector<8x16xf32>
    %638 = arith.addf %634, %637 : vector<8x16xf32>
    %639 = vector.extract_strided_slice %534 {offsets = [0, 0], sizes = [8, 15], strides = [1, 1]} : vector<8x16xf32> to vector<8x15xf32>
    %640 = tpu.concatenate %18, %639 in 1 : vector<8x1xf32>, vector<8x15xf32> -> vector<8x16xf32>
    %641 = vector.extract_strided_slice %534 {offsets = [0, 1], sizes = [8, 15], strides = [1, 1]} : vector<8x16xf32> to vector<8x15xf32>
    %642 = tpu.concatenate %641, %18 in 1 : vector<8x15xf32>, vector<8x1xf32> -> vector<8x16xf32>
    %c33 = arith.constant 33 : index
    %643 = memref.load %arg5[%c33] : memref<144xf32, #tpu.memory_space<smem>>
    %644 = vector.broadcast %643 : f32 to vector<8x16xf32>
    %645 = arith.mulf %644, %640 : vector<8x16xf32>
    %646 = arith.addf %602, %645 : vector<8x16xf32>
    %c34 = arith.constant 34 : index
    %647 = memref.load %arg5[%c34] : memref<144xf32, #tpu.memory_space<smem>>
    %648 = vector.broadcast %647 : f32 to vector<8x16xf32>
    %649 = arith.mulf %648, %534 : vector<8x16xf32>
    %650 = arith.addf %646, %649 : vector<8x16xf32>
    %c35 = arith.constant 35 : index
    %651 = memref.load %arg5[%c35] : memref<144xf32, #tpu.memory_space<smem>>
    %652 = vector.broadcast %651 : f32 to vector<8x16xf32>
    %653 = arith.mulf %652, %642 : vector<8x16xf32>
    %654 = arith.addf %650, %653 : vector<8x16xf32>
    %c69 = arith.constant 69 : index
    %655 = memref.load %arg5[%c69] : memref<144xf32, #tpu.memory_space<smem>>
    %656 = vector.broadcast %655 : f32 to vector<8x16xf32>
    %657 = arith.mulf %656, %640 : vector<8x16xf32>
    %658 = arith.addf %614, %657 : vector<8x16xf32>
    %c70 = arith.constant 70 : index
    %659 = memref.load %arg5[%c70] : memref<144xf32, #tpu.memory_space<smem>>
    %660 = vector.broadcast %659 : f32 to vector<8x16xf32>
    %661 = arith.mulf %660, %534 : vector<8x16xf32>
    %662 = arith.addf %658, %661 : vector<8x16xf32>
    %c71 = arith.constant 71 : index
    %663 = memref.load %arg5[%c71] : memref<144xf32, #tpu.memory_space<smem>>
    %664 = vector.broadcast %663 : f32 to vector<8x16xf32>
    %665 = arith.mulf %664, %642 : vector<8x16xf32>
    %666 = arith.addf %662, %665 : vector<8x16xf32>
    %c105 = arith.constant 105 : index
    %667 = memref.load %arg5[%c105] : memref<144xf32, #tpu.memory_space<smem>>
    %668 = vector.broadcast %667 : f32 to vector<8x16xf32>
    %669 = arith.mulf %668, %640 : vector<8x16xf32>
    %670 = arith.addf %626, %669 : vector<8x16xf32>
    %c106 = arith.constant 106 : index
    %671 = memref.load %arg5[%c106] : memref<144xf32, #tpu.memory_space<smem>>
    %672 = vector.broadcast %671 : f32 to vector<8x16xf32>
    %673 = arith.mulf %672, %534 : vector<8x16xf32>
    %674 = arith.addf %670, %673 : vector<8x16xf32>
    %c107 = arith.constant 107 : index
    %675 = memref.load %arg5[%c107] : memref<144xf32, #tpu.memory_space<smem>>
    %676 = vector.broadcast %675 : f32 to vector<8x16xf32>
    %677 = arith.mulf %676, %642 : vector<8x16xf32>
    %678 = arith.addf %674, %677 : vector<8x16xf32>
    %c141 = arith.constant 141 : index
    %679 = memref.load %arg5[%c141] : memref<144xf32, #tpu.memory_space<smem>>
    %680 = vector.broadcast %679 : f32 to vector<8x16xf32>
    %681 = arith.mulf %680, %640 : vector<8x16xf32>
    %682 = arith.addf %638, %681 : vector<8x16xf32>
    %c142 = arith.constant 142 : index
    %683 = memref.load %arg5[%c142] : memref<144xf32, #tpu.memory_space<smem>>
    %684 = vector.broadcast %683 : f32 to vector<8x16xf32>
    %685 = arith.mulf %684, %534 : vector<8x16xf32>
    %686 = arith.addf %682, %685 : vector<8x16xf32>
    %c143 = arith.constant 143 : index
    %687 = memref.load %arg5[%c143] : memref<144xf32, #tpu.memory_space<smem>>
    %688 = vector.broadcast %687 : f32 to vector<8x16xf32>
    %689 = arith.mulf %688, %642 : vector<8x16xf32>
    %690 = arith.addf %686, %689 : vector<8x16xf32>
    %c0_16 = arith.constant 0 : index
    %c0_17 = arith.constant 0 : index
    %c0_18 = arith.constant 0 : index
    %c0_19 = arith.constant 0 : index
    %691 = vector.load %arg7[%c0_16, %c0_17, %c0_18, %c0_19] : memref<1x4x8x16xf32, #tpu.memory_space<vmem>>, vector<1x1x8x16xf32>
    %692 = vector.shape_cast %691 : vector<1x1x8x16xf32> to vector<8x16xf32>
    %693 = vector.shape_cast %654 : vector<8x16xf32> to vector<1x1x8x16xf32>
    tpu.vector_store %arg7[%c0_16, %c0_17, %c0_18, %c0_19], %693 {strides = array<i32>} : memref<1x4x8x16xf32, #tpu.memory_space<vmem>>, vector<1x1x8x16xf32>,
    %c0_20 = arith.constant 0 : index
    %c1_21 = arith.constant 1 : index
    %c0_22 = arith.constant 0 : index
    %c0_23 = arith.constant 0 : index
    %694 = vector.load %arg7[%c0_20, %c1_21, %c0_22, %c0_23] : memref<1x4x8x16xf32, #tpu.memory_space<vmem>>, vector<1x1x8x16xf32>
    %695 = vector.shape_cast %694 : vector<1x1x8x16xf32> to vector<8x16xf32>
    %696 = vector.shape_cast %666 : vector<8x16xf32> to vector<1x1x8x16xf32>
    tpu.vector_store %arg7[%c0_20, %c1_21, %c0_22, %c0_23], %696 {strides = array<i32>} : memref<1x4x8x16xf32, #tpu.memory_space<vmem>>, vector<1x1x8x16xf32>,
    %c0_24 = arith.constant 0 : index
    %c2_25 = arith.constant 2 : index
    %c0_26 = arith.constant 0 : index
    %c0_27 = arith.constant 0 : index
    %697 = vector.load %arg7[%c0_24, %c2_25, %c0_26, %c0_27] : memref<1x4x8x16xf32, #tpu.memory_space<vmem>>, vector<1x1x8x16xf32>
    %698 = vector.shape_cast %697 : vector<1x1x8x16xf32> to vector<8x16xf32>
    %699 = vector.shape_cast %678 : vector<8x16xf32> to vector<1x1x8x16xf32>
    tpu.vector_store %arg7[%c0_24, %c2_25, %c0_26, %c0_27], %699 {strides = array<i32>} : memref<1x4x8x16xf32, #tpu.memory_space<vmem>>, vector<1x1x8x16xf32>,
    %c0_28 = arith.constant 0 : index
    %c3_29 = arith.constant 3 : index
    %c0_30 = arith.constant 0 : index
    %c0_31 = arith.constant 0 : index
    %700 = vector.load %arg7[%c0_28, %c3_29, %c0_30, %c0_31] : memref<1x4x8x16xf32, #tpu.memory_space<vmem>>, vector<1x1x8x16xf32>
    %701 = vector.shape_cast %700 : vector<1x1x8x16xf32> to vector<8x16xf32>
    %702 = vector.shape_cast %690 : vector<8x16xf32> to vector<1x1x8x16xf32>
    tpu.vector_store %arg7[%c0_28, %c3_29, %c0_30, %c0_31], %702 {strides = array<i32>} : memref<1x4x8x16xf32, #tpu.memory_space<vmem>>, vector<1x1x8x16xf32>,
    return
  }
  func.func @transform_0(%arg0: i32, %arg1: i32) -> (i32, i32, i32, i32) {
    %c0_i32 = arith.constant 0 : i32
    %c0_i32_0 = arith.constant 0 : i32
    %c0_i32_1 = arith.constant 0 : i32
    return %arg0, %c0_i32, %arg1, %c0_i32_0 : i32, i32, i32, i32
  }
  func.func @transform_1(%arg0: i32, %arg1: i32) -> (i32, i32, i32, i32) {
    %c1_i32 = arith.constant 1 : i32
    %0 = arith.muli %arg1, %c1_i32 : i32
    %c1_i32_0 = arith.constant 1 : i32
    %1 = arith.subi %0, %c1_i32_0 : i32
    %c0_i32 = arith.constant 0 : i32
    %2 = arith.maxsi %1, %c0_i32 : i32
    %c0_i32_1 = arith.constant 0 : i32
    %c0_i32_2 = arith.constant 0 : i32
    %c0_i32_3 = arith.constant 0 : i32
    return %arg0, %c0_i32_1, %2, %c0_i32_2 : i32, i32, i32, i32
  }
  func.func @transform_2(%arg0: i32, %arg1: i32) -> (i32, i32, i32, i32) {
    %c1_i32 = arith.constant 1 : i32
    %0 = arith.addi %arg1, %c1_i32 : i32
    %c1_i32_0 = arith.constant 1 : i32
    %1 = arith.muli %0, %c1_i32_0 : i32
    %c1_i32_1 = arith.constant 1 : i32
    %2 = arith.minsi %1, %c1_i32_1 : i32
    %c0_i32 = arith.constant 0 : i32
    %c0_i32_2 = arith.constant 0 : i32
    %c0_i32_3 = arith.constant 0 : i32
    return %arg0, %c0_i32, %2, %c0_i32_2 : i32, i32, i32, i32
  }
  func.func @transform_3(%arg0: i32, %arg1: i32) -> i32 {
    %c0_i32 = arith.constant 0 : i32
    %c0_i32_0 = arith.constant 0 : i32
    return %c0_i32 : i32
  }
  func.func @transform_4(%arg0: i32, %arg1: i32) -> i32 {
    %c0_i32 = arith.constant 0 : i32
    %c0_i32_0 = arith.constant 0 : i32
    return %c0_i32 : i32
  }
  func.func @transform_5(%arg0: i32, %arg1: i32) -> (i32, i32, i32, i32) {
    %c0_i32 = arith.constant 0 : i32
    %c0_i32_0 = arith.constant 0 : i32
    %c0_i32_1 = arith.constant 0 : i32
    return %arg0, %c0_i32, %arg1, %c0_i32_0 : i32, i32, i32, i32
  }
}

</mosaic_0001>

<bundles_post_ra>
// kernel: tpu_custom_call.1
= control target key start
LH: loop header
LB: loop body
LE: loop exit
PB: predicated region body
PF: predicated region fallthrough
CT: control target
= control target key end

     0   :  { %s3445_s0 = inlined_call_operand.hbm [shape: f32[2,4,16,16], index: 0, kind: input, shape index: {}]   ;;  %s3446_s1 = inlined_call_operand.hbm [shape: f32[2,4,16,16], index: 1, kind: input, shape index: {}]   ;;  %s3447_s2 = inlined_call_operand.hbm [shape: f32[2,4,16,16], index: 2, kind: input, shape index: {}]   ;;  %s3448_s3 = inlined_call_operand.vmem [shape: f32[144], index: 3, kind: input, shape index: {}]   ;;  %s3449_s4 = inlined_call_operand.vmem [shape: f32[4], index: 4, kind: input, shape index: {}]   ;;  %s3450_s5 = inlined_call_operand.hbm [shape: f32[2,4,16,16], index: 5, kind: output, shape index: {}]  }
   0x1   :  { %3564 = sst [smem:[#allocation118_spill]] %s3445_s0 }
   0x2   :  { %3565 = sst [smem:[#allocation119_spill]] %s3446_s1 }
   0x3   :  { %3566 = sst [smem:[#allocation120_spill]] %s3447_s2 }
   0x4   :  { %3567 = sst [smem:[#allocation121_spill]] %s3448_s3 }
   0x5   :  { %3568 = sst [smem:[#allocation122_spill]] %s3449_s4 }
   0x6   :  { %3569 = sst [smem:[#allocation123_spill]] %s3450_s5 }
   0x7   :  { %10 = vsyncpa [#allocation3], 0 }
   0x8   :  { %12 = vsyncpa [#allocation3 + $0x1], 0 }
   0x9   :  { %13 = vsyncpa [#allocation7], 0 }
   0xa   :  { %15 = vsyncpa [#allocation7 + $0x1], 0 }
   0xb   :  { %16 = vsyncpa [#allocation5], 0 }
   0xc   :  { %17 = vsyncpa [#allocation11], 0 }
   0xd   :  { %18 = vsyncpa [#allocation4], 0 }
   0xe   :  { %20 = vsyncpa [#allocation4 + $0x1], 0  ;;  %s2015_s18 = smov 0   ;;  %s2017_s19 = smov 0  }
   0xf   :  { %s2019_s20 = smov 0   ;;  %s2021_s21 = smov 0  }
  0x10   :  { %s2023_s22 = smov 0   ;;  %s2025_s23 = smov 0  }
  0x11   :  { %s2027_s24 = smov 0   ;;  %s2029_s25 = smov 0  }
  0x12   :  { %s2031_s26 = smov 0   ;;  %s2033_s27 = smov 0  }
  0x13   :  { %s2035_s28 = smov 0   ;;  %s2037_s29 = smov 0  }
  0x14   :  { %s2039_s30 = smov 0   ;;  %s2041_s6 = smov 0  }
  0x15 LB: > { %3570 = sst [smem:[#allocation19_spill]] %s1921_s19  ;;  %s35_s7 = sadd.s32 1, %s1961_s29  ;;  %s1969_s6 = sphi %s2041_s6, %s26_s6   ;;  %s1965_s30 = sphi %s2039_s30, %s3948_s30   ;;  %s1961_s29 = sphi %s2037_s29, %s3947_s29   ;;  %s1957_s28 = sphi %s2035_s28, %s3946_s28   ;;  %s1953_s27 = sphi %s2033_s27, %s3945_s27   ;;  %s1949_s26 = sphi %s2031_s26, %s3944_s26   ;;  %s1945_s25 = sphi %s2029_s25, %s3943_s25   ;;  %s1941_s24 = sphi %s2027_s24, %s3942_s24   ;;  %s1937_s23 = sphi %s2025_s23, %s3941_s23   ;;  %s1933_s22 = sphi %s2023_s22, %s3940_s22   ;;  %s1929_s21 = sphi %s2021_s21, %s3939_s21   ;;  %s1925_s20 = sphi %s2019_s20, %s3938_s20   ;;  %s1921_s19 = sphi %s2017_s19, %s3937_s19   ;;  %s1917_s18 = sphi %s2015_s18, %s3936_s18  }
  0x16   : > { %3571 = sst [smem:[#allocation20_spill]] %s1925_s20  ;;  %s38_s8 = sadd.s32 1, %s1965_s30 }
  0x17   : > { %3572 = sst [smem:[#allocation21_spill]] %s1933_s22  ;;  %p36_p0 = scmp.ge.s32.totalorder %s35_s7, 2 }
  0x18   : > { %3573 = sst [smem:[#allocation22_spill]] %s1937_s23  ;;  %p3458_p1 = scmp.eq.s32.totalorder %s1969_s6, 0 }
  0x19   : > { %3574 = sst [smem:[#allocation23_spill]] %s1941_s24  ;;  %s81_s9 = sadd.s32 1, %s1937_s23 }
  0x1a   : > { %3575 = sst [smem:[#allocation24_spill]] %s1945_s25  ;;  %s3950_s7 = smov (%p36_p0, %s35_s7), 0 }
  0x1b   : > { %3576 = sst [smem:[#allocation25_spill]] %s1949_s26  ;;  %s3952_s8 = smov (!%p36_p0, %s38_s8), %s1965_s30 }
  0x1c   : > { %3577 = sst [smem:[#allocation26_spill]] %s1953_s27  ;;  %s43_s10 = ssub.s32 %s1961_s29, %s3950_s7 }
  0x1d   : > { %3578 = sst [smem:[#allocation27_spill]] %s1957_s28  ;;  %p40_p2 = scmp.ge.s32.totalorder %s3952_s8, 2 }
  0x1e   : > { %3579 = sst [smem:[#allocation28_spill]] %s1961_s29  ;;  %p88_p3 = scmp.ne.s32.totalorder %s1937_s23, %s1933_s22 }
  0x1f   : > { %3580 = sst [smem:[#allocation29_spill]] %s1965_s30  ;;  %s3954_s8 = smov (%p40_p2, %s3952_s8), 0 }
  0x20   : > { %3581 = sst [smem:[#allocation30_spill]] %s1969_s6  ;;  %s2100_s11 = ssub.s32 %s1965_s30, %s3954_s8 }
  0x21   : > { %3582 = sst [smem:[#allocation31_spill]] %s3950_s7  ;;  %s2103_s12 = sor.u32 %s43_s10, %s2100_s11 }
  0x22   : > { %3583 = sst [smem:[#allocation32_spill]] %s3954_s8  ;;  %p2107_p4 = por %p88_p3, %p3458_p1 }
  0x23   : > { %p3457_p6 = scmp.lt.s32.totalorder %s1969_s6, 4  ;;  %p3455_p7 = scmp.eq.s32.totalorder %s2100_s11, 0 }
  0x24   : > { %s266_s15 = sand.u32 1, %s1969_s6   ;;  %s268_s16 = sand.u32 1, %s1937_s23  }
  0x25   : > { %s2120_s17 = scalar_select %p3455_p7, %s1937_s23, %s81_s9  }
  0x26   : > { %s1357_s8 = sshll.u32 %s268_s16, 5  ;;  %s3456_s7 = sshll.u32 %s1965_s30, 10 }
  0x27   : > { %3585 = sst [smem:[#allocation33_spill]] %s2120_s17  ;;  %s270_s27 = scalar_lea.vmem [#allocation6], %s1357_s8 }
  0x28   : > { %s3586_s1 = sld [smem:[#allocation119_spill]]  ;;  %s281_s2 = sshll.u32 %s270_s27, 4  ;;  %s2130_s2 = int_to_ptr.vmem [resolvable:$true] %s281_s2 }
  0x29   : > { %p2136_p8 = pnand %p3457_p6, %p2107_p4  ;;  %s2140_s16 = scalar_lea.sflag [#allocation7], %s266_s15 }
  0x2b   : > { %p1693_p10 = pneg %p2136_p8 }
  0x2e   : > { %s2128_s28 = scalar_lea.hbm %s3586_s1, %s3456_s7  ;;  %s1696_s27 = scalar_lea.hbm %s3586_s1, 2048 }
  0x2f   : > { %s1691_s14 = scalar_lea.hbm %s2128_s28, 512  ;;  %p1697_p13 = scmp.lt.s32.totalorder %s2128_s28, %s3586_s1 }
  0x30   : > { %p1692_p9 = scmp.ne.s32.totalorder %s2128_s28, %s1691_s14  ;;  %p1698_p0 = scmp.lt.s32.totalorder %s1696_s27, %s1691_s14 }
  0x32   : > { %p1694_p11 = pnand %p1693_p10, %p1692_p9  ;;  %p1699_p2 = por %p1698_p0, %p1697_p13 }
  0x34   : > { %p1695_p12 = pneg %p1694_p11 }
  0x36   : > { %p1700_p3 = pnand %p1699_p2, %p1695_p12 }
  0x38   : > { %1703 = shalt.err (!%p1700_p3)
}
  0x39   : > { %s1704_s15 = scalar_lea.vmem %s2130_s2, 512  ;;  %s1971_s7 = smov [#allocation6]  }
  0x3a   : > { %p1705_p4 = scmp.ne.s32.totalorder %s2130_s2, %s1704_s15  ;;  %s1709_s17 = sshll.u32 %s1971_s7, 4  ;;  %s1710_s17 = int_to_ptr.vmem [resolvable:$false] %s1709_s17 }
  0x3b   : > { %s1711_s5 = scalar_lea.vmem %s1710_s17, 1024  ;;  %p1712_p11 = scmp.lt.s32.totalorder %s2130_s2, %s1710_s17 }
  0x3c   : > { %p1707_p7 = pnand %p1705_p4, %p1693_p10  ;;  %p1713_p6 = scmp.lt.s32.totalorder %s1711_s5, %s1704_s15 }
  0x3e   : > { %p1708_p9 = pneg %p1707_p7  ;;  %p1714_p1 = por %p1713_p6, %p1712_p11 }
  0x40   : > { %p1715_p5 = pnand %p1714_p1, %p1708_p9 }
  0x42   : > { %1718 = shalt.err (!%p1715_p5)
}
  0x43   : > { %s3459_s14 = smov 256   ;;  %s3461_s7 = smov 128  }
  0x44   : > { %s3463_s17 = smov 8   ;;  %s2165_s8 = sadd.s32 4294967295, %s1969_s6  }
  0x45   : > { %1554 = dma.hbm_to_vmem [thread:$0]  (!%p2136_p8), %s2128_s28, 512, %s2130_s2, %s2140_s16, %s3459_s14, %s3461_s7, %s3463_s17  }
  0x46   : > { %s1347_s27 = sadd.s32 4294967294, %s1969_s6   ;;  %p60_p1 = scmp.ne.s32.totalorder %s1945_s25, %s1941_s24 }
  0x47   : > { %p3466_p5 = scmp.eq.s32.totalorder %s2165_s8, 0  ;;  %p94_p6 = scmp.ne.s32.totalorder %s1933_s22, %s1929_s21 }
  0x48   : > { %p128_p7 = scmp.ne.s32.totalorder %s1921_s19, %s1917_s18  ;;  %p202_p0 = scmp.eq.s32.totalorder %s1347_s27, 3 }
  0x49   : > { %p2178_p12 = por %p3466_p5, %p60_p1  ;;  %p2184_p8 = por %p94_p6, %p3466_p5 }
  0x4a   : > { %p2190_p13 = por %p128_p7, %p3466_p5  ;;  %p1350_p2 = scmp.ge.s32.totalorder %s1969_s6, 1 }
  0x4b   : > { %s3588_s2 = scalar_select %p2178_p12, 1, 0 }
  0x4c   : > { %s3589_s28 = scalar_select %p2184_p8, 1, 0 }
  0x4d   : > { %s3590_s9 = scalar_select %p2190_p13, 1, 0 }
  0x4e   : > { %p209_p3 = scmp.lt.s32.totalorder %s1969_s6, 5  ;;  %p2196_p4 = por %p202_p0, %p60_p1 }
  0x4f   : > { %s3594_s3 = sld [smem:[#allocation121_spill]]  ;;  %s3597_s17 = sshll.u32 %s1965_s30, 3 }
  0x50   : > { %s3591_s18 = scalar_select %p2196_p4, 1, 0 }
  0x51   : > { %p2200_p9 = pnand %p1350_p2, %p209_p3  ;;  %s3595_s4 = sld [smem:[#allocation122_spill]] }
  0x52   : > { %3592 = sst [smem:[#allocation34_spill]] %s3591_s18  ;;  %s2221_s1 = sadd.s32 %s1961_s29, %s3597_s17 }
  0x53   : > { %s3593_s21 = scalar_select %p2200_p9, 1, 0 }
  0x54   : > { %p1541_p11 = pneg %p2200_p9  ;;  %s47_s10 = sadd.s32 1, %s1949_s26 }
  0x55   : > { %s222_s15 = sshll.u32 %s3594_s3, 4  ;;  %s223_s15 = int_to_ptr.vmem [resolvable:$true] %s222_s15 }
  0x56   : > { %p2214_p1 = pnand %p1541_p11, %p3466_p5  ;;  %s1719_s13 = scalar_lea.vmem %s223_s15, 32 }
  0x57   : > { %s233_s14 = sshll.u32 %s3595_s4, 4  ;;  %p1720_p6 = scmp.ne.s32.totalorder %s223_s15, %s1719_s13  ;;  %s234_s14 = int_to_ptr.vmem [resolvable:$true] %s233_s14 }
  0x58   : > { %p1721_p7 = pneg %p2214_p1  ;;  %p1727_p3 = scmp.lt.s32.totalorder %s223_s15, %s223_s15 }
  0x59   : > { %p1728_p10 = scmp.lt.s32.totalorder %s1719_s13, %s1719_s13 }
  0x5a   : > { %p1722_p0 = pnand %p1721_p7, %p1720_p6 }
  0x5b   : > { %p1729_p4 = por %p1728_p10, %p1727_p3 }
  0x5c   : > { %p1723_p2 = pneg %p1722_p0 }
  0x5e   : > { %p1730_p13 = pnand %p1729_p4, %p1723_p2 }
  0x60   : > { %1733 = shalt.err (!%p1730_p13)
}
  0x61   : > { %s1975_s5 = smov [#allocation9]   ;;  %s1734_s27 = scalar_lea.vmem %s234_s14, 16 }
  0x62   : > { %1544 = dma.vmem_to_smem (!%p2214_p1), %s223_s15, 32, %s1975_s5, [#allocation5]  }
  0x63   : > { %p1735_p11 = scmp.ne.s32.totalorder %s234_s14, %s1734_s27  ;;  %p1742_p12 = scmp.lt.s32.totalorder %s234_s14, %s234_s14 }
  0x64   : > { %p1743_p9 = scmp.lt.s32.totalorder %s1734_s27, %s1734_s27 }
  0x65   : > { %p1737_p5 = pnand %p1735_p11, %p1721_p7 }
  0x66   : > { %p1744_p6 = por %p1743_p9, %p1742_p12 }
  0x67   : > { %p1738_p8 = pneg %p1737_p5 }
  0x69   : > { %p1745_p0 = pnand %p1744_p6, %p1738_p8 }
  0x6b   : > { %1748 = shalt.err (!%p1745_p0)
}
  0x6c   : > { %s1976_s17 = smov [#allocation10]   ;;  %p3598_p10 = scmp.eq.s32.totalorder %s2103_s12, 0 }
  0x6d   : > { %1547 = dma.vmem_to_smem (!%p2214_p1), %s234_s14, 16, %s1976_s17, [#allocation11]  }
  0x6e   : > { %s2233_s15 = scalar_select %p3598_p10, %s1949_s26, %s47_s10  }
  0x6f   : > { %p54_p5 = scmp.ne.s32.totalorder %s1949_s26, %s1945_s25  ;;  %s244_s13 = sand.u32 1, %s1949_s26  }
  0x70   : > { %3599 = sst [smem:[#allocation35_spill]] %s2233_s15  ;;  %s1354_s5 = sshll.u32 %s244_s13, 5 }
  0x71   : > { %p3600_p12 = scmp.eq.s32.totalorder %s1969_s6, 0  ;;  %p3601_p13 = scmp.eq.s32.totalorder %s2165_s8, 3 }
  0x72   : > { %s1356_s27 = sshll.u32 %s2221_s1, 7  ;;  %s3604_s0 = sld [smem:[#allocation118_spill]] }
  0x73   : > { %p56_p8 = por %p3600_p12, %p54_p5  ;;  %p2242_p4 = por %p3601_p13, %p54_p5 }
  0x74   : > { %s248_s23 = scalar_lea.vmem [#allocation2], %s1354_s5  ;;  %p3605_p9 = scmp.lt.s32.totalorder %s1969_s6, 4 }
  0x75   : > { %s3602_s7 = scalar_select %p2242_p4, 1, 0 }
  0x76   : > { %s256_s14 = sshll.u32 %s248_s23, 4  ;;  %p2252_p1 = pnand %p3605_p9, %p56_p8  ;;  %s257_s14 = int_to_ptr.vmem [resolvable:$true] %s256_s14 }
  0x77   : > { %3603 = sst [smem:[#allocation36_spill]] %s3602_s7  ;;  %s245_s10 = scalar_lea.sflag [#allocation3], %s244_s13 }
  0x78   : > { %s255_s29 = scalar_lea.hbm %s3604_s0, %s1356_s27  ;;  %p1751_p7 = pneg %p2252_p1 }
  0x79   : > { %s1762_s17 = scalar_lea.vmem %s257_s14, 512  ;;  %s1977_s1 = smov [#allocation2]  }
  0x7a   : > { %p1763_p2 = scmp.ne.s32.totalorder %s257_s14, %s1762_s17  ;;  %s1767_s15 = sshll.u32 %s1977_s1, 4  ;;  %s1768_s15 = int_to_ptr.vmem [resolvable:$false] %s1767_s15 }
  0x7b   : > { %s1769_s3 = scalar_lea.vmem %s1768_s15, 1024  ;;  %p1770_p6 = scmp.lt.s32.totalorder %s257_s14, %s1768_s15 }
  0x7c   : > { %p1765_p3 = pnand %p1763_p2, %p1751_p7  ;;  %p1771_p0 = scmp.lt.s32.totalorder %s1769_s3, %s1762_s17 }
  0x7e   : > { %p1766_p11 = pneg %p1765_p3  ;;  %p1772_p10 = por %p1771_p0, %p1770_p6 }
  0x80   : > { %p1773_p5 = pnand %p1772_p10, %p1766_p11 }
  0x82   : > { %1776 = shalt.err (!%p1773_p5)
}
  0x83   : > { %s3607_s4 = smov 8   ;;  %s3608_s23 = smov 128  }
  0x84   : > { %s3609_s13 = smov 256   ;;  %s115_s15 = sadd.s32 1, %s1925_s20 }
  0x85   : > { %1551 = dma.hbm_to_vmem [thread:$0]  (!%p2252_p1), %s255_s29, 512, %s257_s14, %s245_s10, %s3609_s13, %s3608_s23, %s3607_s4  }
  0x86   : > { %p122_p12 = scmp.ne.s32.totalorder %s1925_s20, %s1921_s19  ;;  %s293_s5 = sand.u32 1, %s1925_s20  }
  0x87   : > { %p3610_p8 = scmp.eq.s32.totalorder %s1969_s6, 0  ;;  %s1361_s27 = sshll.u32 %s293_s5, 5 }
  0x88   : > { %s3611_s12 = sshll.u32 %s1965_s30, 10  ;;  %s3612_s0 = sld [smem:[#allocation120_spill]] }
  0x89   : > { %p124_p13 = por %p122_p12, %p3610_p8  ;;  %s1913_s17 = sadd.s32 128, %s3611_s12 }
  0x8a   : > { %s295_s18 = scalar_lea.vmem [#allocation8], %s1361_s27  ;;  %p3614_p1 = scmp.eq.s32.totalorder %s2100_s11, 0 }
  0x8b   : > { %s306_s24 = sshll.u32 %s295_s18, 4  ;;  %p2276_p7 = pnand %p3605_p9, %p124_p13  ;;  %s307_s24 = int_to_ptr.vmem [resolvable:$true] %s306_s24 }
  0x8c   : > { %s2283_s29 = scalar_select %p3614_p1, %s1925_s20, %s115_s15  }
  0x8d   : > { %p1779_p2 = pneg %p2276_p7  ;;  %s1790_s14 = scalar_lea.vmem %s307_s24, 512 }
  0x8e   : > { %s305_s26 = scalar_lea.hbm %s3612_s0, %s1913_s17  ;;  %3615 = sst [smem:[#allocation37_spill]] %s2283_s29 }
  0x8f   : > { %p1791_p3 = scmp.ne.s32.totalorder %s307_s24, %s1790_s14  ;;  %s1978_s10 = smov [#allocation8]  }
  0x90   : > { %s1795_s0 = sshll.u32 %s1978_s10, 4  ;;  %s1796_s0 = int_to_ptr.vmem [resolvable:$false] %s1795_s0 }
  0x91   : > { %p1793_p11 = pnand %p1791_p3, %p1779_p2  ;;  %s1797_s18 = scalar_lea.vmem %s1796_s0, 1024 }
  0x92   : > { %p1798_p0 = scmp.lt.s32.totalorder %s307_s24, %s1796_s0  ;;  %p1799_p10 = scmp.lt.s32.totalorder %s1797_s18, %s1790_s14 }
  0x93   : > { %p1794_p6 = pneg %p1793_p11 }
  0x94   : > { %p1800_p5 = por %p1799_p10, %p1798_p0 }
  0x96   : > { %p1801_p12 = pnand %p1800_p5, %p1794_p6 }
  0x98   : > { %1804 = shalt.err (!%p1801_p12)
}
  0x99   : > { %1557 = dma.hbm_to_vmem [thread:$0]  (!%p2276_p7), %s305_s26, 512, %s307_s24, %s2140_s16, %s3609_s13, %s3608_s23, %s3607_s4  }
  0x9a   : > { %p3616_p8 = scmp.ne.s32.totalorder %s3593_s21, 0 }
  0x9c   : > { %318 = sbr.rel (%p3616_p8) target bundleno = 538 (0x21a), region = 40 }
  0xa1   : > { %s2296_s11 = sand.u32 1, %s1945_s25   ;;  %p3619_p13 = scmp.ne.s32.totalorder %s3588_s2, 0 }
  0xa2   : > { %3617 = sst [smem:[#allocation38_spill]] %s2296_s11  ;;  %s3477_s15 = sshll.u32 %s2296_s11, 5 }
  0xa3   : > { %s321_s5 = scalar_lea.sflag [#allocation3], %s2296_s11  ;;  %s2302_s27 = scalar_lea.vmem [#allocation2], %s3477_s15 }
  0xa4   : > { %3618 = sst [smem:[#allocation39_spill]] %s2302_s27 }
  0xa5   : > { %1888 = dma.done.wait (%p3619_p13), %s321_s5, 512  }
  0xa6   : > { %1890 = vsyncadd (%p3619_p13), %s321_s5, 4294966784  ;;  %s329_s24 = sand.u32 1, %s2165_s8   ;;  %s331_s26 = sand.u32 1, %s1933_s22  }
  0xa7   : > { %s1366_s16 = sshll.u32 %s331_s26, 5  ;;  %s330_s21 = scalar_lea.sflag [#allocation7], %s329_s24 }
  0xa8   : > { %s2310_s7 = scalar_lea.vmem [#allocation6], %s1366_s16  ;;  %p3620_p9 = scmp.ne.s32.totalorder %s3589_s28, 0 }
  0xaa   : > { %1892 = dma.done.wait (%p3620_p9), %s330_s21, 512  }
  0xab   : > { %1894 = vsyncadd (%p3620_p9), %s330_s21, 4294966784  ;;  %s340_s4 = sand.u32 1, %s1921_s19   ;;  %p3621_p7 = scmp.ne.s32.totalorder %s3590_s9, 0 }
  0xac   : > { %s1367_s23 = sshll.u32 %s340_s4, 5 }
  0xad   : > { %s2317_s2 = scalar_lea.vmem [#allocation8], %s1367_s23 }
  0xae   : > { %1896 = dma.done.wait (%p3621_p7), %s330_s21, 512  }
  0xaf   : > { %1898 = vsyncadd (%p3621_p7), %s330_s21, 4294966784  ;;  %p3622_p1 = scmp.eq.s32.totalorder %s2165_s8, 0 }
  0xb1   : > { %1900 = dma.done.wait (%p3622_p1), [#allocation5], 32   ;;  %p3623_p2 = pmov %p3622_p1 }
  0xb2   : > { %p3624_p3 = pmov %p3622_p1 }
  0xb3   : > { %1902 = vsyncadd (%p3623_p2), [#allocation5], 4294967264 }
  0xb4   : > { %1904 = dma.done.wait (%p3624_p3), [#allocation11], 16   ;;  %p3625_p11 = pmov %p3622_p1 }
  0xb6   : > { %1906 = vsyncadd (%p3625_p11), [#allocation11], 4294967280 }
  0xb7   : > { %355 = sfence }
  0xb8   : > { %s3626_s28 = sld [smem:[#allocation26_spill]]  ;;  %v2332_v0 = vld [vmem:[%s2302_s27] sm:$0xff]  ;;  %s1979_s9 = smov 1   ;;  %v399_v3 = vld [vmem:[%s2310_s7 + $0x8] sm:$0xff]  ;;  %vm436_vm0 = vcmask 1040384   ;;  %vm443_vm1 = vcmask 1046528  }
  0xb9   : > { %504 = vrot.lane.b32.xlu1 %v2332_v0, %s1979_s9  ;;  %v398_v1 = vld [vmem:[%s2310_s7] sm:$0xff]  ;;  %s1980_s17 = smov 127   ;;  %s2343_s3 = sld [smem:[#allocation10]]  ;;  %v434_v6 = vrot.slane %v2332_v0, 7  ;;  %v438_v9 = vrot.slane %v2332_v0, 1  ;;  %v2361_v12 = vld [vmem:[%s2302_s27 + $0x8] sm:$0xff] }
  0xba   : > { %v402_v2 = vld [vmem:[%s2317_s2] sm:$0xff]  ;;  %s2347_s14 = sld [smem:[#allocation10 + $0x1]]  ;;  %v621_v17 = vrot.slane %v2361_v12, 7  ;;  %v403_v18 = vld [vmem:[%s2317_s2 + $0x8] sm:$0xff]  ;;  %v400_v21 = vld [vmem:[%s2310_s7 + $0x10] sm:$0xff]  ;;  %v624_v22 = vrot.slane %v2361_v12, 1 }
  0xbb   : > { %s2353_s10 = sld [smem:[#allocation10 + $0x2]]  ;;  %v2415_v25 = vld [vmem:[%s2302_s27 + $0x10] sm:$0xff]  ;;  %v401_v32 = vld [vmem:[%s2310_s7 + $0x18] sm:$0xff]  ;;  %vm449_vm2 = vcmask 7168   ;;  %vm454_vm3 = vcmask 121856   ;;  %vm1166_vm4 = vcmask 130048  }
  0xbc   : > { %s2358_s0 = sld [smem:[#allocation10 + $0x3]]  ;;  %v804_v28 = vrot.slane %v2415_v25, 7  ;;  %v404_v29 = vld [vmem:[%s2317_s2 + $0x10] sm:$0xff]  ;;  %v807_v33 = vrot.slane %v2415_v25, 1  ;;  %v397_v36 = vld [vmem:[%s2302_s27 + $0x18] sm:$0xff] }
  0xbd   : > { %508 = vrot.lane.b32.xlu1 %v2332_v0, %s1980_s17  ;;  %s2363_s18 = sld [smem:[#allocation9]]  ;;  %v987_v39 = vrot.slane %v397_v36, 7  ;;  %v405_v40 = vld [vmem:[%s2317_s2 + $0x18] sm:$0xff]  ;;  %v990_v43 = vrot.slane %v397_v36, 1 }
  0xbe   : > { %p406_p6 = scmp.gt.s32.totalorder %s3626_s28, 0  ;;  %p414_p0 = scmp.lt.s32.totalorder %s3626_s28, 1 }
  0xbf   : > { %3627 = sst [smem:[#allocation40_spill]] %s2343_s3  ;;  %v423_v46 = vstv %s2343_s3 }
  0xc0   : > { %s407_s13 = scalar_select %p406_p6, 1, 0  ;;  %v425_v47 = vstv %s2347_s14 }
  0xc1   : > { %s415_s12 = scalar_select %p414_p0, 1, 0 }
  0xc2   : > { %s408_s8 = scvt.s32.f32 %s407_s13  ;;  %3628 = sst [smem:[#allocation41_spill]] %s2347_s14 }
  0xc3   : > { %s416_s1 = scvt.s32.f32 %s415_s12  ;;  %3629 = sst [smem:[#allocation42_spill]] %s2353_s10  ;;  %v457_v52 = vstv %s2363_s18 }
  0xc4   : > { %v2345_v4 = vstv %s408_s8  ;;  %3630 = sst [smem:[#allocation43_spill]] %s2358_s0 }
  0xc5   : > { %v410_v5 = vmul.f32 %v2345_v4, %v398_v1  ;;  %v2351_v7 = vstv %s416_s1  ;;  %v411_v10 = vmul.f32 %v2345_v4, %v399_v3  ;;  %3631 = sst [smem:[#allocation44_spill]] %s2363_s18  ;;  %v412_v24 = vmul.f32 %v2345_v4, %v400_v21 }
  0xc6   : > { %v418_v8 = vmul.f32 %v2351_v7, %v402_v2  ;;  %s2365_s5 = sld [smem:[#allocation9 + $0x24]]  ;;  %v419_v20 = vmul.f32 %v2351_v7, %v403_v18  ;;  %v420_v31 = vmul.f32 %v2351_v7, %v404_v29  ;;  %v413_v35 = vmul.f32 %v2345_v4, %v401_v32 }
  0xc7   : > { %v431_v11 = vrot.slane %v410_v5, 7  ;;  %s2370_s24 = sld [smem:[#allocation9 + $0x48]]  ;;  %v618_v16 = vrot.slane %v411_v10, 7  ;;  %v801_v27 = vrot.slane %v412_v24, 7  ;;  %v421_v42 = vmul.f32 %v2351_v7, %v405_v40 }
  0xc8   : > { %v441_v13 = vrot.slane %v418_v8, 1  ;;  %s2378_s26 = sld [smem:[#allocation9 + $0x6c]]  ;;  %v627_v23 = vrot.slane %v419_v20, 1  ;;  %v810_v34 = vrot.slane %v420_v31, 1  ;;  %v984_v38 = vrot.slane %v413_v35, 7 }
  0xc9   : > { %v2368_v14 = vsel %vm436_vm0, %v431_v11, %v434_v6  ;;  %s2383_s16 = sld [smem:[#allocation9 + $0x1]]  ;;  %v2392_v19 = vsel %vm436_vm0, %v618_v16, %v621_v17  ;;  %v2443_v30 = vsel %vm436_vm0, %v801_v27, %v804_v28  ;;  %v993_v44 = vrot.slane %v421_v42, 1 }
  0xca   : > { %446 = vrot.lane.b32.xlu0 %v2368_v14, %s1979_s9  ;;  %v2375_v15 = vsel %vm443_vm1, %v438_v9, %v441_v13  ;;  %s2385_s21 = sld [smem:[#allocation9 + $0x2]]  ;;  %v2426_v26 = vsel %vm443_vm1, %v624_v22, %v627_v23  ;;  %v2475_v37 = vsel %vm443_vm1, %v807_v33, %v810_v34  ;;  %v2491_v41 = vsel %vm436_vm0, %v984_v38, %v987_v39 }
  0xcb   : > { %565 = vrot.lane.b32.xlu1 %v2375_v15, %s1980_s17  ;;  %s2387_s4 = sld [smem:[#allocation9 + $0x25]]  ;;  %v2518_v45 = vsel %vm443_vm1, %v990_v43, %v993_v44 }
  0xcc   : > { %3632 = sst [smem:[#allocation45_spill]] %s2365_s5  ;;  %3663 = vst [vmem:[#allocation76_spill] sm:$0xff] %v2518_v45  ;;  %v469_v54 = vstv %s2365_s5 }
  0xcd   : > { %3633 = sst [smem:[#allocation46_spill]] %s2370_s24  ;;  %v481_v55 = vstv %s2370_s24 }
  0xce   : > { %3634 = sst [smem:[#allocation47_spill]] %s2378_s26  ;;  %451 = vrot.lane.b32.xlu0 %v2368_v14, %s1980_s17  ;;  %v493_v56 = vstv %s2378_s26 }
  0xcf   : > { %s2395_s23 = sld [smem:[#allocation9 + $0x26]]  ;;  %635 = vrot.lane.b32.xlu1 %v2392_v19, %s1980_s17  ;;  %v461_v48 = vstv %s2383_s16 }
  0xd0   : > { %3635 = sst [smem:[#allocation48_spill]] %s2385_s21  ;;  %v2624_v60 = vmul.f32 %v461_v48, %v2368_v14 }
  0xd1   : > { %s2400_s13 = sld [smem:[#allocation9 + $0x49]]  ;;  %v473_v49 = vstv %s2387_s4 }
  0xd2   : > { %s2402_s12 = sld [smem:[#allocation9 + $0x4a]]  ;;  %561 = vrot.lane.b32.xlu0 %v2375_v15, %s1979_s9  ;;  %v2627_v61 = vmul.f32 %v473_v49, %v2368_v14 }
  0xd3   : > { %s2404_s8 = sld [smem:[#allocation9 + $0x6d]]  ;;  %691 = vrot.lane.b32.xlu1 %v2361_v12, %s1980_s17 }
  0xd4   : > { %s2410_s1 = sld [smem:[#allocation9 + $0x6e]] }
  0xd5   : > { %3636 = sst [smem:[#allocation49_spill]] %s2395_s23 }
  0xd6   : > { %s2417_s15 = sld [smem:[#allocation9 + $0x3]]  ;;  %631 = vrot.lane.b32.xlu0 %v2392_v19, %s1979_s9 }
  0xd7   : > { %s2419_s30 = sld [smem:[#allocation9 + $0x27]]  ;;  %748 = vrot.lane.b32.xlu1 %v2426_v26, %s1980_s17  ;;  %v485_v53 = vstv %s2400_s13 }
  0xd8   : > { %3637 = sst [smem:[#allocation50_spill]] %s2402_s12  ;;  %v2633_v63 = vmul.f32 %v485_v53, %v2368_v14 }
  0xd9   : > { %s2421_s25 = sld [smem:[#allocation9 + $0x4b]]  ;;  %v497_v57 = vstv %s2404_s8 }
  0xda   : > { %3638 = sst [smem:[#allocation51_spill]] %s2410_s1  ;;  %687 = vrot.lane.b32.xlu0 %v2361_v12, %s1979_s9  ;;  %v2641_v4 = vmul.f32 %v497_v57, %v2368_v14 }
  0xdb   : > { %s2429_s22 = sld [smem:[#allocation9 + $0x6f]]  ;;  %818 = vrot.lane.b32.xlu1 %v2443_v30, %s1980_s17 }
  0xdc   : > { %3639 = sst [smem:[#allocation52_spill]] %s2417_s15  ;;  %v513_v5 = vstv %s2417_s15 }
  0xdd   : > { %3640 = sst [smem:[#allocation53_spill]] %s2419_s30 }
  0xde   : > { %s2434_s29 = sld [smem:[#allocation9 + $0x4]]  ;;  %744 = vrot.lane.b32.xlu0 %v2426_v26, %s1979_s9 }
  0xdf   : > { %3641 = sst [smem:[#allocation54_spill]] %s2421_s25  ;;  %874 = vrot.lane.b32.xlu1 %v2415_v25, %s1980_s17 }
  0xe0   : > { %s2436_s20 = sld [smem:[#allocation9 + $0x5]] }
  0xe1   : > { %3642 = sst [smem:[#allocation55_spill]] %s2429_s22 }
  0xe2   : > { %s2438_s19 = sld [smem:[#allocation9 + $0x28]]  ;;  %814 = vrot.lane.b32.xlu0 %v2443_v30, %s1979_s9 }
  0xe3   : > { %s2446_s6 = sld [smem:[#allocation9 + $0x29]]  ;;  %931 = vrot.lane.b32.xlu1 %v2475_v37, %s1980_s17 }
  0xe4   : > { %s2451_s11 = sld [smem:[#allocation9 + $0x4c]]  ;;  %v517_v1 = vstv %s2434_s29 }
  0xe5   : > { %s2453_s28 = sld [smem:[#allocation9 + $0x4d]]  ;;  %v2656_v14 = vmul.f32 %v517_v1, %v2332_v0 }
  0xe6   : > { %3643 = sst [smem:[#allocation56_spill]] %s2436_s20  ;;  %870 = vrot.lane.b32.xlu0 %v2415_v25, %s1979_s9 }
  0xe7   : > { %s2455_s20 = sld [smem:[#allocation9 + $0x70]]  ;;  %1001 = vrot.lane.b32.xlu1 %v2491_v41, %s1980_s17 }
  0xe8   : > { %s2466_s7 = sld [smem:[#allocation9 + $0x6]]  ;;  %v529_v2 = vstv %s2438_s19 }
  0xe9   : > { %3644 = sst [smem:[#allocation57_spill]] %s2446_s6  ;;  %v2659_v16 = vmul.f32 %v529_v2, %v2332_v0 }
  0xea   : > { %s2461_s6 = sld [smem:[#allocation9 + $0x71]]  ;;  %927 = vrot.lane.b32.xlu0 %v2475_v37, %s1979_s9  ;;  %v541_v6 = vstv %s2451_s11 }
  0xeb   : > { %3645 = sst [smem:[#allocation58_spill]] %s2453_s28  ;;  %1057 = vrot.lane.b32.xlu1 %v397_v36, %s1980_s17  ;;  %v2665_v18 = vmul.f32 %v541_v6, %v2332_v0 }
  0xec   : > { %s2468_s28 = sld [smem:[#allocation9 + $0x2a]] }
  0xed   : > { %3646 = sst [smem:[#allocation59_spill]] %s2455_s20 }
  0xee   : > { %3648 = sst [smem:[#allocation61_spill]] %s2466_s7  ;;  %997 = vrot.lane.b32.xlu0 %v2491_v41, %s1979_s9 }
  0xef   : > { %s2470_s20 = sld [smem:[#allocation9 + $0x4e]]  ;;  %1114 = vrot.lane.b32.xlu1 %v2518_v45, %s1980_s17 }
  0xf0   : > { %3647 = sst [smem:[#allocation60_spill]] %s2461_s6 }
  0xf1   : > { %s2477_s22 = sld [smem:[#allocation9 + $0x72]] }
  0xf2   : > { %3649 = sst [smem:[#allocation62_spill]] %s2468_s28  ;;  %1053 = vrot.lane.b32.xlu0 %v397_v36, %s1979_s9 }
  0xf3   : > { %s2482_s27 = sld [smem:[#allocation9 + $0x7]] }
  0xf4   : > { %s2484_s7 = sld [smem:[#allocation9 + $0x8]] }
  0xf5   : > { %3650 = sst [smem:[#allocation63_spill]] %s2470_s20 }
  0xf6   : > { %s2486_s28 = sld [smem:[#allocation9 + $0x2b]]  ;;  %1110 = vrot.lane.b32.xlu0 %v2518_v45, %s1979_s9 }
  0xf7   : > { %3651 = sst [smem:[#allocation64_spill]] %s2477_s22 }
  0xf8   : > { %s2494_s20 = sld [smem:[#allocation9 + $0x2c]] }
  0xf9   : > { %3652 = sst [smem:[#allocation65_spill]] %s2482_s27 }
  0xfa   : > { %3653 = sst [smem:[#allocation66_spill]] %s2484_s7 }
  0xfb   : > { %s2498_s2 = sld [smem:[#allocation9 + $0x4f]] }
  0xfc   : > { %3654 = sst [smem:[#allocation67_spill]] %s2486_s28 }
  0xfd   : > { %s2500_s22 = sld [smem:[#allocation9 + $0x50]] }
  0xfe   : > { %3655 = sst [smem:[#allocation68_spill]] %s2494_s20 }
  0xff   : > { %s2502_s7 = sld [smem:[#allocation9 + $0x73]] }
 0x100   : > { %s2506_s6 = sld [smem:[#allocation9 + $0x74]] }
 0x101   : > { %3656 = sst [smem:[#allocation69_spill]] %s2498_s2 }
 0x102   : > { %s2509_s28 = sld [smem:[#allocation9 + $0x9]] }
 0x103   : > { %3657 = sst [smem:[#allocation70_spill]] %s2500_s22 }
 0x104   : > { %s2511_s20 = sld [smem:[#allocation9 + $0x2d]] }
 0x105   : > { %3658 = sst [smem:[#allocation71_spill]] %s2502_s7 }
 0x106   : > { %3659 = sst [smem:[#allocation72_spill]] %s2506_s6 }
 0x107   : > { %s2513_s27 = sld [smem:[#allocation9 + $0x51]] }
 0x108   : > { %3660 = sst [smem:[#allocation73_spill]] %s2509_s28 }
 0x109   : > { %s2520_s22 = sld [smem:[#allocation9 + $0x75]] }
 0x10a   : > { %3661 = sst [smem:[#allocation74_spill]] %s2511_s20 }
 0x10b   : > { %s2524_s6 = sld [smem:[#allocation9 + $0xa]] }
 0x10c   : > { %s2526_s7 = sld [smem:[#allocation9 + $0xb]] }
 0x10d   : > { %3662 = sst [smem:[#allocation75_spill]] %s2513_s27 }
 0x10e   : > { %s2528_s28 = sld [smem:[#allocation9 + $0x2e]] }
 0x10f   : > { %3664 = sst [smem:[#allocation77_spill]] %s2520_s22 }
 0x110   : > { %s2531_s27 = sld [smem:[#allocation9 + $0x2f]] }
 0x111   : > { %3665 = sst [smem:[#allocation78_spill]] %s2524_s6 }
 0x112   : > { %3666 = sst [smem:[#allocation79_spill]] %s2526_s7 }
 0x113   : > { %s2533_s20 = sld [smem:[#allocation9 + $0x52]] }
 0x114   : > { %3667 = sst [smem:[#allocation80_spill]] %s2528_s28 }
 0x115   : > { %s2535_s2 = sld [smem:[#allocation9 + $0x53]] }
 0x116   : > { %3668 = sst [smem:[#allocation81_spill]] %s2531_s27 }
 0x117   : > { %s2537_s25 = sld [smem:[#allocation9 + $0x76]] }
 0x118   : > { %s2541_s17 = sld [smem:[#allocation9 + $0x77]] }
 0x119   : > { %3669 = sst [smem:[#allocation82_spill]] %s2533_s20 }
 0x11a   : > { %s2543_s22 = sld [smem:[#allocation9 + $0xc]] }
 0x11b   : > { %3670 = sst [smem:[#allocation83_spill]] %s2535_s2 }
 0x11c   : > { %s2545_s7 = sld [smem:[#allocation9 + $0x30]] }
 0x11d   : > { %3671 = sst [smem:[#allocation84_spill]] %s2537_s25 }
 0x11e   : > { %3672 = sst [smem:[#allocation85_spill]] %s2541_s17 }
 0x11f   : > { %s2547_s28 = sld [smem:[#allocation9 + $0x54]] }
 0x120   : > { %3673 = sst [smem:[#allocation86_spill]] %s2543_s22 }
 0x121   : > { %s2549_s6 = sld [smem:[#allocation9 + $0x78]] }
 0x122   : > { %3674 = sst [smem:[#allocation87_spill]] %s2545_s7 }
 0x123   : > { %s2551_s27 = sld [smem:[#allocation9 + $0xd]] }
 0x124   : > { %s2553_s20 = sld [smem:[#allocation9 + $0xe]] }
 0x125   : > { %3675 = sst [smem:[#allocation88_spill]] %s2547_s28 }
 0x126   : > { %s2555_s2 = sld [smem:[#allocation9 + $0x31]] }
 0x127   : > { %3676 = sst [smem:[#allocation89_spill]] %s2549_s6 }
 0x128   : > { %s2557_s25 = sld [smem:[#allocation9 + $0x32]] }
 0x129   : > { %s2559_s30 = sld [smem:[#allocation9 + $0x55]] }
 0x12a   : > { %3677 = sst [smem:[#allocation90_spill]] %s2553_s20 }
 0x12b   : > { %s2561_s9 = sld [smem:[#allocation9 + $0x56]]  ;;  %v505_v24 = vpop.permute.xlu1 %504 }
 0x12c   : > { %3678 = sst [smem:[#allocation91_spill]] %s2555_s2  ;;  %v507_v59 = vsel %vm449_vm2, 0.0, %v505_v24 }
 0x12d   : > { %s2563_s17 = sld [smem:[#allocation9 + $0x79]] }
 0x12e   : > { %3679 = sst [smem:[#allocation92_spill]] %s2557_s25 }
 0x12f   : > { %s2565_s22 = sld [smem:[#allocation9 + $0x7a]]  ;;  %v724_v53 = vstv %s2559_s30 }
 0x130   : > { %s2567_s7 = sld [smem:[#allocation9 + $0xf]]  ;;  %v2760_v44 = vmul.f32 %v724_v53, %v2361_v12 }
 0x131   : > { %3680 = sst [smem:[#allocation93_spill]] %s2561_s9 }
 0x132   : > { %s2569_s28 = sld [smem:[#allocation9 + $0x33]] }
 0x133   : > { %3681 = sst [smem:[#allocation94_spill]] %s2563_s17 }
 0x134   : > { %s2571_s6 = sld [smem:[#allocation9 + $0x57]] }
 0x135   : > { %3682 = sst [smem:[#allocation95_spill]] %s2565_s22 }
 0x136   : > { %3683 = sst [smem:[#allocation96_spill]] %s2567_s7 }
 0x137   : > { %s2573_s20 = sld [smem:[#allocation9 + $0x7b]] }
 0x138   : > { %3684 = sst [smem:[#allocation97_spill]] %s2569_s28 }
 0x139   : > { %s2575_s2 = sld [smem:[#allocation9 + $0x10]] }
 0x13a   : > { %3685 = sst [smem:[#allocation98_spill]] %s2571_s6 }
 0x13b   : > { %s2577_s25 = sld [smem:[#allocation9 + $0x11]] }
 0x13c   : > { %s2579_s9 = sld [smem:[#allocation9 + $0x34]] }
 0x13d   : > { %3686 = sst [smem:[#allocation99_spill]] %s2573_s20 }
 0x13e   : > { %s2581_s17 = sld [smem:[#allocation9 + $0x35]] }
 0x13f   : > { %s2583_s7 = sld [smem:[#allocation9 + $0x58]] }
 0x140   : > { %s2585_s28 = sld [smem:[#allocation9 + $0x59]] }
 0x141   : > { %3687 = sst [smem:[#allocation100_spill]] %s2577_s25 }
 0x142   : > { %3688 = sst [smem:[#allocation101_spill]] %s2579_s9 }
 0x143   : > { %s2587_s6 = sld [smem:[#allocation9 + $0x7c]] }
 0x144   : > { %3689 = sst [smem:[#allocation102_spill]] %s2581_s17 }
 0x145   : > { %3690 = sst [smem:[#allocation103_spill]] %s2583_s7 }
 0x146   : > { %3691 = sst [smem:[#allocation104_spill]] %s2585_s28 }
 0x147   : > { %s2589_s20 = sld [smem:[#allocation9 + $0x7d]] }
 0x148   : > { %s2591_s22 = sld [smem:[#allocation9 + $0x12]] }
 0x149   : > { %s2593_s25 = sld [smem:[#allocation9 + $0x36]]  ;;  %v793_v29 = vstv %s2587_s6 }
 0x14a   : > { %s2595_s9 = sld [smem:[#allocation9 + $0x5a]] }
 0x14b   : > { %s2597_s17 = sld [smem:[#allocation9 + $0x7e]] }
 0x14c   : > { %s2599_s7 = sld [smem:[#allocation9 + $0x13]] }
 0x14d   : > { %3692 = sst [smem:[#allocation105_spill]] %s2589_s20 }
 0x14e   : > { %3693 = sst [smem:[#allocation106_spill]] %s2591_s22 }
 0x14f   : > { %3694 = sst [smem:[#allocation107_spill]] %s2593_s25 }
 0x150   : > { %3695 = sst [smem:[#allocation108_spill]] %s2595_s9 }
 0x151   : > { %3696 = sst [smem:[#allocation109_spill]] %s2597_s17 }
 0x152   : > { %s2601_s28 = sld [smem:[#allocation9 + $0x14]] }
 0x153   : > { %s2607_s22 = sld [smem:[#allocation9 + $0x37]] }
 0x154   : > { %s2613_s17 = sld [smem:[#allocation9 + $0x38]] }
 0x155   : > { %s2619_s16 = sld [smem:[#allocation9 + $0x5b]] }
 0x156   : > { %s3699_s4 = sld [smem:[#allocation53_spill]] }
 0x157   : > { %s3700_s14 = sld [smem:[#allocation54_spill]] }
 0x158   : > { %3697 = sst [smem:[#allocation110_spill]] %s2601_s28 }
 0x159   : > { %s3701_s0 = sld [smem:[#allocation55_spill]]  ;;  %v839_v28 = vstv %s2607_s22 }
 0x15a   : > { %3698 = sst [smem:[#allocation111_spill]] %s2613_s17 }
 0x15b   : > { %s3702_s13 = sld [smem:[#allocation59_spill]]  ;;  %v851_v53 = vstv %s2619_s16 }
 0x15c   : > { %s2629_s10 = sld [smem:[#allocation9 + $0x5c]]  ;;  %v525_v7 = vstv %s3699_s4  ;;  %v2824_v31 = vmul.f32 %v851_v53, %v2443_v30  ;;  %v509_v53 = vpop.permute.xlu1 %508 }
 0x15d   : > { %s3704_s3 = sld [smem:[#allocation56_spill]]  ;;  %v537_v8 = vstv %s3700_s14 }
 0x15e   : > { %s3705_s8 = sld [smem:[#allocation57_spill]] }
 0x15f   : > { %s2637_s21 = sld [smem:[#allocation9 + $0x7f]]  ;;  %v549_v9 = vstv %s3701_s0 }
 0x160   : > { %s3706_s23 = sld [smem:[#allocation58_spill]] }
 0x161   : > { %s3707_s26 = sld [smem:[#allocation65_spill]]  ;;  %v553_v10 = vstv %s3702_s13 }
 0x162   : > { %3703 = sst [smem:[#allocation59_spill]] %s2629_s10  ;;  %v2673_v23 = vmul.f32 %v553_v10, %v2332_v0 }
 0x163   : > { %s3708_s24 = sld [smem:[#allocation67_spill]]  ;;  %v521_v11 = vstv %s3704_s3 }
 0x164   : > { %s2645_s5 = sld [smem:[#allocation9 + $0x80]]  ;;  %v533_v13 = vstv %s3705_s8 }
 0x165   : > { %s3710_s12 = sld [smem:[#allocation60_spill]] }
 0x166   : > { %s3712_s29 = sld [smem:[#allocation69_spill]]  ;;  %v545_v17 = vstv %s3706_s23 }
 0x167   : > { %s2651_s19 = sld [smem:[#allocation9 + $0x15]]  ;;  %v574_v20 = vstv %s3707_s26 }
 0x168   : > { %s3717_s11 = sld [smem:[#allocation71_spill]]  ;;  %v2688_v34 = vmul.f32 %v574_v20, %v2375_v15 }
 0x169   : > { %s2661_s4 = sld [smem:[#allocation9 + $0x39]]  ;;  %v586_v21 = vstv %s3708_s24 }
 0x16a   : > { %3709 = sst [smem:[#allocation65_spill]] %s2645_s5  ;;  %v2691_v35 = vmul.f32 %v586_v21, %v2375_v15 }
 0x16b   : > { %s2669_s3 = sld [smem:[#allocation9 + $0x5d]]  ;;  %v557_v22 = vstv %s3710_s12 }
 0x16c   : > { %s3723_s0 = sld [smem:[#allocation78_spill]]  ;;  %v598_v27 = vstv %s3712_s29 }
 0x16d   : > { %3713 = sst [smem:[#allocation67_spill]] %s2651_s19  ;;  %v2697_v38 = vmul.f32 %v598_v27, %v2375_v15  ;;  %v700_v27 = vstv %s2551_s27 }
 0x16e   : > { %s3724_s15 = sld [smem:[#allocation80_spill]]  ;;  %v610_v32 = vstv %s3717_s11 }
 0x16f   : > { %3718 = sst [smem:[#allocation69_spill]] %s2661_s4  ;;  %v2705_v43 = vmul.f32 %v610_v32, %v2375_v15  ;;  %v863_v15 = vstv %s2637_s21 }
 0x170   : > { %s2677_s4 = sld [smem:[#allocation9 + $0x81]] }
 0x171   : > { %3721 = sst [smem:[#allocation71_spill]] %s2669_s3 }
 0x172   : > { %s3728_s26 = sld [smem:[#allocation82_spill]]  ;;  %v644_v39 = vstv %s3723_s0 }
 0x173   : > { %s2683_s24 = sld [smem:[#allocation9 + $0x16]]  ;;  %v2718_v2 = vmul.f32 %v644_v39, %v2392_v19 }
 0x174   : > { %s3732_s29 = sld [smem:[#allocation84_spill]]  ;;  %v656_v40 = vstv %s3724_s15 }
 0x175   : > { %s2693_s10 = sld [smem:[#allocation9 + $0x17]]  ;;  %v2722_v6 = vmul.f32 %v656_v40, %v2392_v19  ;;  %v757_v40 = vstv %s2575_s2 }
 0x176   : > { %3725 = sst [smem:[#allocation78_spill]] %s2677_s4 }
 0x177   : > { %s2701_s1 = sld [smem:[#allocation9 + $0x3a]] }
 0x178   : > { %s3737_s13 = sld [smem:[#allocation91_spill]]  ;;  %v668_v48 = vstv %s3728_s26 }
 0x179   : > { %s2709_s14 = sld [smem:[#allocation9 + $0x3b]]  ;;  %v2728_v20 = vmul.f32 %v668_v48, %v2392_v19  ;;  %v883_v42 = vstv %s2683_s24 }
 0x17a   : > { %v680_v1 = vstv %s3732_s29  ;;  %s2715_s15 = sld [smem:[#allocation9 + $0x5e]]  ;;  %v2846_v58 = vmul.f32 %v883_v42, %v2415_v25 }
 0x17b   : > { %3733 = sst [smem:[#allocation80_spill]] %s2693_s10  ;;  %v2736_v39 = vmul.f32 %v680_v1, %v2392_v19  ;;  %v2750_v19 = vmul.f32 %v700_v27, %v2361_v12  ;;  %v827_v1 = vstv %s2599_s7 }
 0x17c   : > { %s3744_s26 = sld [smem:[#allocation94_spill]] }
 0x17d   : > { %s2725_s3 = sld [smem:[#allocation9 + $0x5f]] }
 0x17e   : > { %s3746_s29 = sld [smem:[#allocation90_spill]]  ;;  %v712_v32 = vstv %s3737_s13 }
 0x17f   : > { %3738 = sst [smem:[#allocation82_spill]] %s2709_s14  ;;  %v2754_v57 = vmul.f32 %v712_v32, %v2361_v12 }
 0x180   : > { %s2733_s12 = sld [smem:[#allocation9 + $0x82]] }
 0x181   : > { %s3749_s17 = sld [smem:[#allocation93_spill]] }
 0x182   : > { %s3750_s11 = sld [smem:[#allocation101_spill]]  ;;  %v736_v21 = vstv %s3744_s26 }
 0x183   : > { %3745 = sst [smem:[#allocation84_spill]] %s2725_s3  ;;  %v2768_v27 = vmul.f32 %v736_v21, %v2361_v12  ;;  %v2782_v12 = vmul.f32 %v757_v40, %v2426_v26  ;;  %v2800_v40 = vmul.f32 %v793_v29, %v2426_v26  ;;  %v2818_v21 = vmul.f32 %v839_v28, %v2443_v30 }
 0x184   : > { %s2741_s3 = sld [smem:[#allocation9 + $0x83]]  ;;  %v2832_v29 = vmul.f32 %v863_v15, %v2443_v30 }
 0x185   : > { %s3752_s14 = sld [smem:[#allocation95_spill]] }
 0x186   : > { %3748 = sst [smem:[#allocation91_spill]] %s2733_s12 }
 0x187   : > { %s3753_s18 = sld [smem:[#allocation96_spill]] }
 0x188   : > { %s3754_s27 = sld [smem:[#allocation103_spill]]  ;;  %v769_v10 = vstv %s3750_s11 }
 0x189   : > { %s2747_s13 = sld [smem:[#allocation9 + $0x18]]  ;;  %v2786_v32 = vmul.f32 %v769_v10, %v2426_v26  ;;  %v907_v10 = vstv %s2715_s15 }
 0x18a   : > { %3751 = sst [smem:[#allocation94_spill]] %s2741_s3  ;;  %v2857_v62 = vmul.f32 %v907_v10, %v2415_v25  ;;  %v526_v10 = vmul.f32 %v525_v7, %v507_v59 }
 0x18b   : > { %s3755_s12 = sld [smem:[#allocation97_spill]] }
 0x18c   : > { %s2757_s30 = sld [smem:[#allocation9 + $0x3c]] }
 0x18d   : > { %s2765_s23 = sld [smem:[#allocation9 + $0x60]] }
 0x18e   : > { %v781_v48 = vstv %s3754_s27  ;;  %s2773_s5 = sld [smem:[#allocation9 + $0x84]] }
 0x18f   : > { %s2779_s11 = sld [smem:[#allocation9 + $0x19]]  ;;  %v2792_v49 = vmul.f32 %v781_v48, %v2426_v26  ;;  %v2814_v26 = vmul.f32 %v827_v1, %v2443_v30  ;;  %v895_v1 = vstv %s2701_s1  ;;  %v538_v30 = vmul.f32 %v537_v8, %v507_v59 }
 0x190   : > { %s2789_s8 = sld [smem:[#allocation9 + $0x1a]]  ;;  %v2850_v15 = vmul.f32 %v895_v1, %v2415_v25 }
 0x191   : > { %s2797_s10 = sld [smem:[#allocation9 + $0x3d]] }
 0x192   : > { %3758 = sst [smem:[#allocation90_spill]] %s2757_s30 }
 0x193   : > { %3761 = sst [smem:[#allocation93_spill]] %s2765_s23 }
 0x194   : > { %s3766_s26 = sld [smem:[#allocation59_spill]] }
 0x195   : > { %s2805_s19 = sld [smem:[#allocation9 + $0x3e]]  ;;  %v940_v28 = vstv %s2779_s11 }
 0x196   : > { %s3767_s0 = sld [smem:[#allocation65_spill]]  ;;  %v2883_v24 = vmul.f32 %v940_v28, %v2475_v37  ;;  %v447_v28 = vpop.permute.xlu0 %446 }
 0x197   : > { %s3768_s22 = sld [smem:[#allocation67_spill]]  ;;  %v952_v42 = vstv %s2797_s10 }
 0x198   : > { %s2811_s7 = sld [smem:[#allocation9 + $0x61]]  ;;  %3787 = vst [vmem:[#allocation113_spill] sm:$0xff] %v2883_v24 }
 0x199   : > { %s3771_s25 = sld [smem:[#allocation91_spill]] }
 0x19a   : > { %s2821_s9 = sld [smem:[#allocation9 + $0x62]] }
 0x19b   : > { %s2829_s20 = sld [smem:[#allocation9 + $0x85]] }
 0x19c   : > { %s2837_s28 = sld [smem:[#allocation9 + $0x86]] }
 0x19d   : > { %s2843_s1 = sld [smem:[#allocation9 + $0x1b]] }
 0x19e   : > { %s2853_s24 = sld [smem:[#allocation9 + $0x3f]]  ;;  %v964_v0 = vstv %s2811_s7 }
 0x19f   : > { %v919_v48 = vstv %s3771_s25  ;;  %s2861_s15 = sld [smem:[#allocation9 + $0x63]]  ;;  %v2902_v36 = vmul.f32 %v964_v0, %v2475_v37 }
 0x1a0   : > { %3772 = sst [smem:[#allocation101_spill]] %s2821_s9  ;;  %v2864_v1 = vmul.f32 %v919_v48, %v2415_v25  ;;  %v2879_v25 = vmul.f32 %v513_v5, %v507_v59  ;;  %v511_v48 = vsel %vm454_vm3, %v509_v53, 0.0  ;;  %v550_v5 = vmul.f32 %v549_v9, %v507_v59 }
 0x1a1   : > { %s2869_s16 = sld [smem:[#allocation9 + $0x87]]  ;;  %v976_v3 = vstv %s2829_s20  ;;  %v2898_v53 = vmul.f32 %v952_v42, %v2475_v37  ;;  %3789 = vst [vmem:[#allocation115_spill] sm:$0xff] %v2902_v36  ;;  %v2907_v8 = vmul.f32 %v521_v11, %v511_v48  ;;  %v2911_v59 = vmul.f32 %v533_v13, %v511_v48 }
 0x1a2   : > { %3780 = vst [vmem:[#allocation112_spill] sm:$0xff] %v2864_v1  ;;  %s2875_s6 = sld [smem:[#allocation9 + $0x1c]]  ;;  %v2915_v9 = vmul.f32 %v545_v17, %v511_v48  ;;  %v2919_v42 = vmul.f32 %v557_v22, %v511_v48  ;;  %v2922_v0 = vmul.f32 %v976_v3, %v2475_v37  ;;  %v450_v13 = vsel %vm449_vm2, 0.0, %v447_v28  ;;  %v566_v17 = vpop.permute.xlu1 %565 }
 0x1a3   : > { %s2886_s23 = sld [smem:[#allocation9 + $0x1d]]  ;;  %3788 = vst [vmem:[#allocation114_spill] sm:$0xff] %v2898_v53  ;;  %v458_v48 = vmul.f32 %v457_v52, %v450_v13  ;;  %v470_v37 = vmul.f32 %v469_v54, %v450_v13  ;;  %v482_v3 = vmul.f32 %v481_v55, %v450_v13  ;;  %v494_v11 = vmul.f32 %v493_v56, %v450_v13  ;;  %v452_v56 = vpop.permute.xlu0 %451 }
 0x1a4   : > { %3776 = sst [smem:[#allocation95_spill]] %s2853_s24  ;;  %3794 = vst [vmem:[#allocation116_spill] sm:$0xff] %v2922_v0  ;;  %v568_v33 = vsel %vm454_vm3, %v566_v17, 0.0  ;;  %v455_v13 = vsel %vm454_vm3, %v452_v56, 0.0 }
 0x1a5   : > { %3778 = sst [smem:[#allocation96_spill]] %s2861_s15  ;;  %v459_v7 = vadd.f32 %v458_v48, %v423_v46  ;;  %v471_v52 = vadd.f32 %v470_v37, %v425_v47 }
 0x1a6   : > { %s2895_s10 = sld [smem:[#allocation9 + $0x40]]  ;;  %v636_v46 = vpop.permute.xlu1 %635 }
 0x1a7   : > { %s3797_s25 = sld [smem:[#allocation42_spill]]  ;;  %v463_v47 = vadd.f32 %v2624_v60, %v459_v7  ;;  %v562_v7 = vpop.permute.xlu0 %561 }
 0x1a8   : > { %s3798_s3 = sld [smem:[#allocation43_spill]]  ;;  %v1010_v22 = vstv %s2875_s6 }
 0x1a9   : > { %s3799_s30 = sld [smem:[#allocation66_spill]]  ;;  %v2941_v28 = vmul.f32 %v1010_v22, %v2491_v41 }
 0x1aa   : > { %s3800_s11 = sld [smem:[#allocation68_spill]] }
 0x1ab   : > { %s3801_s9 = sld [smem:[#allocation70_spill]]  ;;  %3803 = vst [vmem:[#allocation117_spill] sm:$0xff] %v2941_v28 }
 0x1ac   : > { %s3802_s24 = sld [smem:[#allocation48_spill]] }
 0x1ad   : > { %s3804_s15 = sld [smem:[#allocation49_spill]]  ;;  %v3806_v45 = vstv %s3797_s25 }
 0x1ae   : > { %s3805_s6 = sld [smem:[#allocation50_spill]]  ;;  %v483_v54 = vadd.f32 %v482_v3, %v3806_v45  ;;  %v3808_v55 = vstv %s3798_s3 }
 0x1af   : > { %s3807_s7 = sld [smem:[#allocation51_spill]]  ;;  %v495_v0 = vadd.f32 %v494_v11, %v3808_v55  ;;  %v3809_v17 = vstv %s3799_s30  ;;  %v475_v11 = vadd.f32 %v2627_v61, %v471_v52  ;;  %v638_v61 = vsel %vm454_vm3, %v636_v46, 0.0 }
 0x1b0   : > { %s3810_s27 = sld [smem:[#allocation72_spill]]  ;;  %v2956_v22 = vmul.f32 %v3809_v17, %v568_v33  ;;  %v3811_v28 = vstv %s3800_s11  ;;  %v487_v55 = vadd.f32 %v2633_v63, %v483_v54  ;;  %v564_v54 = vsel %vm449_vm2, 0.0, %v562_v7 }
 0x1b1   : > { %v2960_v50 = vmul.f32 %v3811_v28, %v568_v33  ;;  %v3812_v51 = vstv %s3801_s9  ;;  %s3814_s20 = sld [smem:[#allocation79_spill]]  ;;  %v499_v28 = vadd.f32 %v2641_v4, %v495_v0  ;;  %v692_v4 = vpop.permute.xlu1 %691 }
 0x1b2   : > { %v2964_v36 = vmul.f32 %v3812_v51, %v568_v33  ;;  %v3813_v48 = vstv %s3802_s24  ;;  %s3817_s4 = sld [smem:[#allocation61_spill]] }
 0x1b3   : > { %v466_v45 = vmul.f32 %v3813_v48, %v455_v13  ;;  %v3815_v37 = vstv %s3804_s15  ;;  %s3818_s21 = sld [smem:[#allocation62_spill]] }
 0x1b4   : > { %v478_v3 = vmul.f32 %v3815_v37, %v455_v13  ;;  %v3816_v56 = vstv %s3805_s6  ;;  %s3820_s9 = sld [smem:[#allocation63_spill]] }
 0x1b5   : > { %v490_v17 = vmul.f32 %v3816_v56, %v455_v13  ;;  %v3819_v51 = vstv %s3807_s7  ;;  %v467_v24 = vadd.f32 %v466_v45, %v463_v47  ;;  %s3821_s24 = sld [smem:[#allocation64_spill]] }
 0x1b6   : > { %v502_v53 = vmul.f32 %v3819_v51, %v455_v13  ;;  %v479_v60 = vadd.f32 %v478_v3, %v475_v11  ;;  %v3822_v48 = vstv %s3810_s27  ;;  %s3823_s15 = sld [smem:[#allocation81_spill]] }
 0x1b7   : > { %v615_v1 = vmul.f32 %v3822_v48, %v568_v33  ;;  %v491_v52 = vadd.f32 %v490_v17, %v487_v55  ;;  %s3824_s2 = sld [smem:[#allocation83_spill]]  ;;  %v3825_v37 = vstv %s3814_s20  ;;  %v515_v0 = vadd.f32 %v2879_v25, %v467_v24  ;;  %v632_v24 = vpop.permute.xlu0 %631 }
 0x1b8   : > { %v503_v63 = vadd.f32 %v502_v53, %v499_v28  ;;  %v2984_v56 = vmul.f32 %v3825_v37, %v638_v61  ;;  %s3826_s25 = sld [smem:[#allocation85_spill]]  ;;  %v527_v13 = vadd.f32 %v526_v10, %v479_v60  ;;  %v3827_v47 = vstv %s3817_s4 }
 0x1b9   : > { %v571_v45 = vmul.f32 %v3827_v47, %v564_v54  ;;  %v3828_v11 = vstv %s3818_s21  ;;  %v539_v3 = vadd.f32 %v538_v30, %v491_v52  ;;  %s3829_s3 = sld [smem:[#allocation73_spill]]  ;;  %v519_v51 = vadd.f32 %v2656_v14, %v515_v0 }
 0x1ba   : > { %v583_v33 = vmul.f32 %v3828_v11, %v564_v54  ;;  %v551_v46 = vadd.f32 %v550_v5, %v503_v63  ;;  %v3830_v55 = vstv %s3820_s9  ;;  %s3831_s30 = sld [smem:[#allocation74_spill]]  ;;  %v531_v7 = vadd.f32 %v2659_v16, %v527_v13 }
 0x1bb   : > { %v595_v53 = vmul.f32 %v3830_v55, %v564_v54  ;;  %v3832_v17 = vstv %s3821_s24  ;;  %s3833_s11 = sld [smem:[#allocation75_spill]]  ;;  %v543_v30 = vadd.f32 %v2665_v18, %v539_v3  ;;  %v634_v52 = vsel %vm449_vm2, 0.0, %v632_v24 }
 0x1bc   : > { %v607_v28 = vmul.f32 %v3832_v17, %v564_v54  ;;  %s3834_s6 = sld [smem:[#allocation77_spill]]  ;;  %v3835_v10 = vstv %s3823_s15  ;;  %v555_v5 = vadd.f32 %v2673_v23, %v551_v46  ;;  %v749_v54 = vpop.permute.xlu1 %748  ;;  %v523_v14 = vadd.f32 %v2907_v8, %v519_v51  ;;  %v688_v51 = vpop.permute.xlu0 %687 }
 0x1bd   : > { %v661_v25 = vmul.f32 %v3835_v10, %v638_v61  ;;  %v3836_v60 = vstv %s3824_s2  ;;  %v535_v16 = vadd.f32 %v2911_v59, %v531_v7  ;;  %s3840_s7 = sld [smem:[#allocation86_spill]]  ;;  %v547_v55 = vadd.f32 %v2915_v9, %v543_v30 }
 0x1be   : > { %v673_v48 = vmul.f32 %v3836_v60, %v638_v61  ;;  %v3837_v63 = vstv %s3826_s25  ;;  %s3841_s27 = sld [smem:[#allocation87_spill]]  ;;  %v559_v18 = vadd.f32 %v2919_v42, %v555_v5  ;;  %v572_v17 = vadd.f32 %v571_v45, %v523_v14 }
 0x1bf   : > { %v685_v37 = vmul.f32 %v3837_v63, %v638_v61  ;;  %v3838_v0 = vstv %s3829_s3  ;;  %s3844_s20 = sld [smem:[#allocation88_spill]]  ;;  %v584_v8 = vadd.f32 %v583_v33, %v535_v16  ;;  %v694_v59 = vsel %vm454_vm3, %v692_v4, 0.0 }
 0x1c0   : > { %v641_v13 = vmul.f32 %v3838_v0, %v634_v52  ;;  %v3839_v47 = vstv %s3831_s30  ;;  %s3845_s4 = sld [smem:[#allocation89_spill]]  ;;  %v751_v7 = vsel %vm454_vm3, %v749_v54, 0.0  ;;  %v596_v24 = vadd.f32 %v595_v53, %v547_v55 }
 0x1c1   : > { %v653_v11 = vmul.f32 %v3839_v47, %v634_v52  ;;  %v3842_v23 = vstv %s3833_s11  ;;  %s3846_s21 = sld [smem:[#allocation92_spill]]  ;;  %v608_v9 = vadd.f32 %v607_v28, %v559_v18  ;;  %v690_v10 = vsel %vm449_vm2, 0.0, %v688_v51 }
 0x1c2   : > { %v665_v3 = vmul.f32 %v3842_v23, %v634_v52  ;;  %v3843_v46 = vstv %s3834_s6  ;;  %v3847_v42 = vstv %s3746_s29  ;;  %v576_v30 = vadd.f32 %v2688_v34, %v572_v17  ;;  %s3852_s29 = sld [smem:[#allocation98_spill]]  ;;  %v745_v23 = vpop.permute.xlu0 %744 }
 0x1c3   : > { %v677_v61 = vmul.f32 %v3843_v46, %v634_v52  ;;  %v705_v60 = vmul.f32 %v3847_v42, %v694_v59  ;;  %v588_v45 = vadd.f32 %v2691_v35, %v584_v8  ;;  %v3848_v5 = vstv %s3840_s7  ;;  %s3853_s9 = sld [smem:[#allocation99_spill]] }
 0x1c4   : > { %v697_v33 = vmul.f32 %v3848_v5, %v690_v10  ;;  %v3849_v52 = vstv %s3841_s27  ;;  %v600_v4 = vadd.f32 %v2697_v38, %v596_v24  ;;  %v612_v53 = vadd.f32 %v2705_v43, %v608_v9  ;;  %s3856_s24 = sld [smem:[#allocation100_spill]] }
 0x1c5   : > { %v709_v63 = vmul.f32 %v3849_v52, %v690_v10  ;;  %v3850_v28 = vstv %s3844_s20  ;;  %v580_v0 = vadd.f32 %v2956_v22, %v576_v30  ;;  %v592_v34 = vadd.f32 %v2960_v50, %v588_v45  ;;  %s3857_s15 = sld [smem:[#allocation102_spill]] }
 0x1c6   : > { %v721_v54 = vmul.f32 %v3850_v28, %v690_v10  ;;  %v3851_v14 = vstv %s3845_s4  ;;  %v3855_v55 = vstv %s3749_s17  ;;  %v604_v38 = vadd.f32 %v2964_v36, %v600_v4  ;;  %s3859_s2 = sld [smem:[#allocation104_spill]]  ;;  %v819_v4 = vpop.permute.xlu1 %818 }
 0x1c7   : > { %v733_v16 = vmul.f32 %v3851_v14, %v690_v10  ;;  %v3854_v35 = vstv %s3846_s21  ;;  %v729_v18 = vmul.f32 %v3855_v55, %v694_v59  ;;  %v616_v43 = vadd.f32 %v615_v1, %v612_v53  ;;  %s3861_s25 = sld [smem:[#allocation105_spill]] }
 0x1c8   : > { %v717_v47 = vmul.f32 %v3854_v35, %v694_v59  ;;  %v3858_v46 = vstv %s3752_s14  ;;  %v747_v8 = vsel %vm449_vm2, 0.0, %v745_v23  ;;  %v642_v51 = vadd.f32 %v641_v13, %v580_v0  ;;  %s3865_s14 = sld [smem:[#allocation106_spill]] }
 0x1c9   : > { %v741_v17 = vmul.f32 %v3858_v46, %v694_v59  ;;  %v654_v22 = vadd.f32 %v653_v11, %v592_v34  ;;  %v3860_v24 = vstv %s3753_s18  ;;  %v3862_v9 = vstv %s3755_s12  ;;  %s3866_s17 = sld [smem:[#allocation107_spill]] }
 0x1ca   : > { %v754_v50 = vmul.f32 %v3860_v24, %v747_v8  ;;  %v766_v10 = vmul.f32 %v3862_v9, %v747_v8  ;;  %v666_v42 = vadd.f32 %v665_v3, %v604_v38  ;;  %v678_v30 = vadd.f32 %v677_v61, %v616_v43  ;;  %s3869_s18 = sld [smem:[#allocation108_spill]]  ;;  %v815_v3 = vpop.permute.xlu0 %814 }
 0x1cb   : > { %v3863_v45 = vstv %s3852_s29  ;;  %v3864_v52 = vstv %s3853_s9  ;;  %v646_v1 = vadd.f32 %v2718_v2, %v642_v51  ;;  %v658_v13 = vadd.f32 %v2722_v6, %v654_v22  ;;  %s3870_s12 = sld [smem:[#allocation109_spill]] }
 0x1cc   : > { %v778_v5 = vmul.f32 %v3863_v45, %v747_v8  ;;  %v790_v36 = vmul.f32 %v3864_v52, %v747_v8  ;;  %v3867_v59 = vstv %s3856_s24  ;;  %v3868_v53 = vstv %s3857_s15  ;;  %s3873_s3 = sld [smem:[#allocation110_spill]] }
 0x1cd   : > { %v3057_v11 = vmul.f32 %v3867_v59, %v751_v7  ;;  %v3061_v28 = vmul.f32 %v3868_v53, %v751_v7  ;;  %v670_v61 = vadd.f32 %v2728_v20, %v666_v42  ;;  %v682_v14 = vadd.f32 %v2736_v39, %v678_v30  ;;  %s3874_s30 = sld [smem:[#allocation111_spill]]  ;;  %v875_v30 = vpop.permute.xlu1 %874 }
 0x1ce   : > { %v3871_v0 = vstv %s3859_s2  ;;  %v3872_v2 = vstv %s3861_s25  ;;  %v650_v6 = vadd.f32 %v2984_v56, %v646_v1  ;;  %v662_v55 = vadd.f32 %v661_v25, %v658_v13  ;;  %v871_v25 = vpop.permute.xlu0 %870  ;;  %s3879_s11 = sld [smem:[#allocation69_spill]] }
 0x1cf   : > { %v3067_v34 = vmul.f32 %v3871_v0, %v751_v7  ;;  %v3071_v35 = vmul.f32 %v3872_v2, %v751_v7  ;;  %v817_v23 = vsel %vm449_vm2, 0.0, %v815_v3  ;;  %v821_v38 = vsel %vm454_vm3, %v819_v4, 0.0  ;;  %s3882_s6 = sld [smem:[#allocation71_spill]] }
 0x1d0   : > { %v674_v43 = vadd.f32 %v673_v48, %v670_v61  ;;  %v686_v20 = vadd.f32 %v685_v37, %v682_v14  ;;  %v3875_v46 = vstv %s3865_s14  ;;  %v3876_v8 = vstv %s3866_s17  ;;  %s3883_s7 = sld [smem:[#allocation78_spill]] }
 0x1d1   : > { %v824_v39 = vmul.f32 %v3875_v46, %v817_v23  ;;  %v836_v51 = vmul.f32 %v3876_v8, %v817_v23  ;;  %v698_v22 = vadd.f32 %v697_v33, %v650_v6  ;;  %v710_v7 = vadd.f32 %v709_v63, %v662_v55  ;;  %s3886_s27 = sld [smem:[#allocation80_spill]]  ;;  %v932_v8 = vpop.permute.xlu1 %931 }
 0x1d2   : > { %v3877_v24 = vstv %s3869_s18  ;;  %v3878_v56 = vstv %s3870_s12  ;;  %v722_v45 = vadd.f32 %v721_v54, %v674_v43  ;;  %v734_v52 = vadd.f32 %v733_v16, %v686_v20  ;;  %s3887_s20 = sld [smem:[#allocation82_spill]]  ;;  %v928_v46 = vpop.permute.xlu0 %927 }
 0x1d3   : > { %v848_v9 = vmul.f32 %v3877_v24, %v817_v23  ;;  %v860_v42 = vmul.f32 %v3878_v56, %v817_v23  ;;  %v3880_v48 = vstv %s3873_s3  ;;  %v3881_v37 = vstv %s3874_s30  ;;  %s3889_s4 = sld [smem:[#allocation84_spill]] }
 0x1d4   : > { %v3086_v4 = vmul.f32 %v3880_v48, %v821_v38  ;;  %v3090_v1 = vmul.f32 %v3881_v37, %v821_v38  ;;  %v702_v33 = vadd.f32 %v2750_v19, %v698_v22  ;;  %v714_v63 = vadd.f32 %v2754_v57, %v710_v7  ;;  %s3898_s21 = sld [smem:[#allocation93_spill]] }
 0x1d5   : > { %v3884_v13 = vstv %s3766_s26  ;;  %v3885_v53 = vstv %s3767_s0  ;;  %v726_v54 = vadd.f32 %v2760_v44, %v722_v45  ;;  %v738_v16 = vadd.f32 %v2768_v27, %v734_v52  ;;  %s3891_s0 = sld [smem:[#allocation94_spill]] }
 0x1d6   : > { %v3096_v59 = vmul.f32 %v3884_v13, %v821_v38  ;;  %v3100_v3 = vmul.f32 %v3885_v53, %v821_v38  ;;  %v873_v61 = vsel %vm449_vm2, 0.0, %v871_v25  ;;  %v877_v14 = vsel %vm454_vm3, %v875_v30, 0.0  ;;  %s3896_s26 = sld [smem:[#allocation90_spill]] }
 0x1d7   : > { %v706_v0 = vadd.f32 %v705_v60, %v702_v33  ;;  %v718_v19 = vadd.f32 %v717_v47, %v714_v63  ;;  %v3888_v2 = vstv %s3768_s22  ;;  %v3890_v6 = vstv %s3879_s11  ;;  %s3130_s22 = sld [smem:[#allocation9 + $0x41]] }
 0x1d8   : > { %v3108_v57 = vmul.f32 %v3888_v2, %v873_v61  ;;  %v3112_v55 = vmul.f32 %v3890_v6, %v873_v61  ;;  %v730_v23 = vadd.f32 %v729_v18, %v726_v54  ;;  %v742_v44 = vadd.f32 %v741_v17, %v738_v16  ;;  %s3140_s29 = sld [smem:[#allocation9 + $0x64]] }
 0x1d9   : > { %v3892_v38 = vstv %s3882_s6  ;;  %v3893_v27 = vstv %s3883_s7  ;;  %v755_v60 = vadd.f32 %v754_v50, %v706_v0  ;;  %v767_v47 = vadd.f32 %v766_v10, %v718_v19  ;;  %s3146_s9 = sld [smem:[#allocation9 + $0x65]] }
 0x1da   : > { %v3116_v43 = vmul.f32 %v3892_v38, %v873_v61  ;;  %v3120_v20 = vmul.f32 %v3893_v27, %v873_v61  ;;  %v3894_v22 = vstv %s3886_s27  ;;  %v3895_v24 = vstv %s3887_s20  ;;  %s3901_s24 = sld [smem:[#allocation101_spill]]  ;;  %v998_v61 = vpop.permute.xlu0 %997 }
 0x1db   : > { %v3124_v7 = vmul.f32 %v3894_v22, %v877_v14  ;;  %v3128_v56 = vmul.f32 %v3895_v24, %v877_v14  ;;  %v779_v18 = vadd.f32 %v778_v5, %v730_v23  ;;  %v791_v17 = vadd.f32 %v790_v36, %v742_v44  ;;  %s3158_s15 = sld [smem:[#allocation9 + $0x88]] }
 0x1dc   : > { %v3897_v25 = vstv %s3889_s4  ;;  %v3899_v45 = vstv %s3891_s0  ;;  %v759_v10 = vadd.f32 %v2782_v12, %v755_v60  ;;  %v771_v52 = vadd.f32 %v2786_v32, %v767_v47  ;;  %s3906_s2 = sld [smem:[#allocation95_spill]] }
 0x1dd   : > { %v3134_v30 = vmul.f32 %v3897_v25, %v877_v14  ;;  %v3138_v50 = vmul.f32 %v3899_v45, %v877_v14  ;;  %v930_v48 = vsel %vm449_vm2, 0.0, %v928_v46  ;;  %v934_v5 = vsel %vm454_vm3, %v932_v8, 0.0  ;;  %s3190_s25 = sld [smem:[#allocation9 + $0x1e]] }
 0x1de   : > { %v783_v36 = vadd.f32 %v2792_v49, %v779_v18  ;;  %v795_v37 = vadd.f32 %v2800_v40, %v791_v17  ;;  %v3900_v33 = vstv %s2747_s13  ;;  %v3902_v13 = vstv %s3896_s26  ;;  %s3170_s13 = sld [smem:[#allocation9 + $0x89]] }
 0x1df   : > { %v3152_v63 = vmul.f32 %v3900_v33, %v930_v48  ;;  %v3156_v12 = vmul.f32 %v3902_v13, %v930_v48  ;;  %v763_v32 = vadd.f32 %v3057_v11, %v759_v10  ;;  %v775_v53 = vadd.f32 %v3061_v28, %v771_v52  ;;  %s3250_s14 = sld [smem:[#allocation9 + $0x44]] }
 0x1e0   : > { %v3903_v54 = vstv %s3898_s21  ;;  %v3904_v49 = vstv %s2773_s5  ;;  %v787_v14 = vadd.f32 %v3067_v34, %v783_v36  ;;  %v799_v0 = vadd.f32 %v3071_v35, %v795_v37  ;;  %s3909_s5 = sld [smem:[#allocation96_spill]]  ;;  %v1002_v36 = vpop.permute.xlu1 %1001 }
 0x1e1   : > { %v3164_v16 = vmul.f32 %v3903_v54, %v930_v48  ;;  %v3168_v40 = vmul.f32 %v3904_v49, %v930_v48  ;;  %v3905_v19 = vstv %s2789_s8  ;;  %v3907_v28 = vstv %s2805_s19  ;;  %s3198_s8 = sld [smem:[#allocation9 + $0x42]] }
 0x1e2   : > { %v3176_v11 = vmul.f32 %v3905_v19, %v934_v5  ;;  %v3180_v2 = vmul.f32 %v3907_v28, %v934_v5  ;;  %v825_v6 = vadd.f32 %v824_v39, %v763_v32  ;;  %v837_v23 = vadd.f32 %v836_v51, %v775_v53  ;;  %s3222_s19 = sld [smem:[#allocation9 + $0x8a]] }
 0x1e3   : > { %v3908_v44 = vstv %s3901_s24  ;;  %v3910_v27 = vstv %s2837_s28  ;;  %v849_v34 = vadd.f32 %v848_v9, %v787_v14  ;;  %v861_v35 = vadd.f32 %v860_v42, %v799_v0  ;;  %s3210_s28 = sld [smem:[#allocation9 + $0x66]] }
 0x1e4   : > { %v3184_v38 = vmul.f32 %v3908_v44, %v934_v5  ;;  %v3188_v46 = vmul.f32 %v3910_v27, %v934_v5  ;;  %v1000_v8 = vsel %vm449_vm2, 0.0, %v998_v61  ;;  %v3911_v60 = vstv %s2895_s10  ;;  %s3242_s10 = sld [smem:[#allocation9 + $0x43]] }
 0x1e5   : > { %v3196_v39 = vmul.f32 %v3911_v60, %v2491_v41  ;;  %v829_v51 = vadd.f32 %v2814_v26, %v825_v6  ;;  %v841_v47 = vadd.f32 %v2818_v21, %v837_v23  ;;  %v3912_v22 = vstv %s2843_s1  ;;  %s3228_s1 = sld [smem:[#allocation9 + $0x1f]] }
 0x1e6   : > { %v3204_v24 = vmul.f32 %v3912_v22, %v1000_v8  ;;  %v3913_v18 = vstv %s3906_s2  ;;  %v853_v42 = vadd.f32 %v2824_v31, %v849_v34  ;;  %v865_v17 = vadd.f32 %v2832_v29, %v861_v35  ;;  %s3260_s17 = sld [smem:[#allocation9 + $0x67]] }
 0x1e7   : > { %v3208_v9 = vmul.f32 %v3913_v18, %v1000_v8  ;;  %v3914_v25 = vstv %s3909_s5  ;;  %v3915_v10 = vstv %s2869_s16  ;;  %v833_v21 = vadd.f32 %v3086_v4, %v829_v51  ;;  %s3236_s16 = sld [smem:[#allocation9 + $0x20]] }
 0x1e8   : > { %v3216_v45 = vmul.f32 %v3914_v25, %v1000_v8  ;;  %v3220_v26 = vmul.f32 %v3915_v10, %v1000_v8  ;;  %v845_v52 = vadd.f32 %v3090_v1, %v841_v47  ;;  %v1026_v48 = vstv %s3130_s22  ;;  %s3268_s18 = sld [smem:[#allocation9 + $0x68]]  ;;  %v3919_v47 = vld [vmem:[#allocation113_spill] sm:$0xff] }
 0x1e9   : > { %v1034_v5 = vstv %s3140_s29  ;;  %v857_v31 = vadd.f32 %v3096_v59, %v853_v42  ;;  %v869_v29 = vadd.f32 %v3100_v3, %v865_v17  ;;  %v1038_v33 = vstv %s3146_s9  ;;  %s3280_s12 = sld [smem:[#allocation9 + $0x8c]]  ;;  %v3921_v17 = vld [vmem:[#allocation115_spill] sm:$0xff] }
 0x1ea   : > { %v3233_v37 = vmul.f32 %v1034_v5, %v2491_v41  ;;  %v881_v4 = vadd.f32 %v3108_v57, %v833_v21  ;;  %v893_v1 = vadd.f32 %v3112_v55, %v845_v52  ;;  %v1046_v13 = vstv %s3158_s15  ;;  %s3918_s3 = sld [smem:[#allocation39_spill]] }
 0x1eb   : > { %v1050_v32 = vstv %s3170_s13  ;;  %v905_v53 = vadd.f32 %v3116_v43, %v857_v31  ;;  %v917_v59 = vadd.f32 %v3120_v20, %v869_v29  ;;  %v3247_v3 = vmul.f32 %v1046_v13, %v2491_v41  ;;  %v3917_v20 = vld [vmem:[#allocation112_spill] sm:$0xff]  ;;  %s3288_s30 = sld [smem:[#allocation9 + $0x21]]  ;;  %v1058_v13 = vpop.permute.xlu1 %1057 }
 0x1ec   : > { %v1004_v54 = vsel %vm454_vm3, %v1002_v36, 0.0  ;;  %v885_v57 = vadd.f32 %v2846_v58, %v881_v4  ;;  %v897_v55 = vadd.f32 %v2850_v15, %v893_v1  ;;  %v3916_v49 = vstv %s2886_s23  ;;  %v1054_v58 = vpop.permute.xlu0 %1053  ;;  %s3274_s23 = sld [smem:[#allocation9 + $0x8b]] }
 0x1ed   : > { %v3256_v61 = vmul.f32 %v3916_v49, %v1004_v54  ;;  %v3258_v43 = vmul.f32 %v1026_v48, %v1004_v54  ;;  %v909_v41 = vadd.f32 %v2857_v62, %v905_v53  ;;  %v921_v14 = vadd.f32 %v3917_v20, %v917_v59  ;;  %s3292_s11 = sld [smem:[#allocation9 + $0x45]] }
 0x1ee   : > { %v3264_v0 = vmul.f32 %v1038_v33, %v1004_v54  ;;  %v3266_v19 = vmul.f32 %v1050_v32, %v1004_v54  ;;  %v889_v15 = vadd.f32 %v3124_v7, %v885_v57  ;;  %v901_v28 = vadd.f32 %v3128_v56, %v897_v55  ;;  %s3298_s6 = sld [smem:[#allocation9 + $0x69]] }
 0x1ef   : > { %v1062_v6 = vstv %s3190_s25  ;;  %v1074_v23 = vstv %s3198_s8  ;;  %v913_v62 = vadd.f32 %v3134_v30, %v909_v41  ;;  %v925_v44 = vadd.f32 %v3138_v50, %v921_v14  ;;  %s3304_s7 = sld [smem:[#allocation9 + $0x8d]] }
 0x1f0   : > { %v1086_v27 = vstv %s3210_s28  ;;  %v1098_v34 = vstv %s3222_s19  ;;  %v938_v35 = vadd.f32 %v3152_v63, %v889_v15  ;;  %v950_v8 = vadd.f32 %v3156_v12, %v901_v28  ;;  %v3920_v63 = vld [vmem:[#allocation114_spill] sm:$0xff]  ;;  %s3309_s27 = sld [smem:[#allocation9 + $0x22]]  ;;  %v1111_v28 = vpop.permute.xlu0 %1110 }
 0x1f1   : > { %v1056_v7 = vsel %vm449_vm2, 0.0, %v1054_v58  ;;  %v1066_v56 = vstv %s3228_s1  ;;  %v962_v60 = vadd.f32 %v3164_v16, %v913_v62  ;;  %v974_v51 = vadd.f32 %v3168_v40, %v925_v44  ;;  %v3922_v16 = vld [vmem:[#allocation116_spill] sm:$0xff]  ;;  %v1690_v40 = vld [vmem:[%s3918_s3 + $0x18] sm:$0xff]  ;;  %s3314_s20 = sld [smem:[#allocation9 + $0x23]] }
 0x1f2   : > { %v1063_v30 = vmul.f32 %v1062_v6, %v1056_v7  ;;  %v1075_v50 = vmul.f32 %v1074_v23, %v1056_v7  ;;  %v942_v22 = vadd.f32 %v3919_v47, %v938_v35  ;;  %v954_v18 = vadd.f32 %v3920_v63, %v950_v8  ;;  %s3320_s4 = sld [smem:[#allocation9 + $0x46]]  ;;  %v3926_v63 = vld [vmem:[#allocation76_spill] sm:$0xff] }
 0x1f3   : > { %v1087_v42 = vmul.f32 %v1086_v27, %v1056_v7  ;;  %v1099_v12 = vmul.f32 %v1098_v34, %v1056_v7  ;;  %v966_v25 = vadd.f32 %v3921_v17, %v962_v60  ;;  %v978_v10 = vadd.f32 %v3922_v16, %v974_v51  ;;  %s3325_s0 = sld [smem:[#allocation9 + $0x47]] }
 0x1f4   : > { %v1067_v21 = vmul.f32 %v1690_v40, %v1066_v56  ;;  %v1070_v52 = vstv %s3236_s16  ;;  %v946_v48 = vadd.f32 %v3176_v11, %v942_v22  ;;  %v958_v5 = vadd.f32 %v3180_v2, %v954_v18  ;;  %s3329_s26 = sld [smem:[#allocation9 + $0x6a]] }
 0x1f5   : > { %v1078_v36 = vstv %s3242_s10  ;;  %v1082_v31 = vstv %s3250_s14  ;;  %v970_v29 = vadd.f32 %v3184_v38, %v966_v25  ;;  %v982_v33 = vadd.f32 %v3188_v46, %v978_v10  ;;  %v3923_v46 = vld [vmem:[#allocation117_spill] sm:$0xff]  ;;  %s3333_s22 = sld [smem:[#allocation9 + $0x6b]]  ;;  %v1115_v10 = vpop.permute.xlu1 %1114 }
 0x1f6   : > { %v1079_v4 = vmul.f32 %v1690_v40, %v1078_v36  ;;  %v1090_v1 = vstv %s3260_s17  ;;  %v1008_v32 = vadd.f32 %v3204_v24, %v946_v48  ;;  %v1020_v11 = vadd.f32 %v3208_v9, %v958_v5  ;;  %s3339_s21 = sld [smem:[#allocation9 + $0x8e]] }
 0x1f7   : > { %v1091_v2 = vmul.f32 %v1690_v40, %v1090_v1  ;;  %v1094_v53 = vstv %s3268_s18  ;;  %v1032_v59 = vadd.f32 %v3216_v45, %v970_v29  ;;  %v1044_v54 = vadd.f32 %v3220_v26, %v982_v33  ;;  %s3924_s29 = sld [smem:[#allocation27_spill]] }
 0x1f8   : > { %v1102_v38 = vstv %s3274_s23  ;;  %v1106_v57 = vstv %s3280_s12  ;;  %v1012_v55 = vadd.f32 %v3923_v46, %v1008_v32  ;;  %v1024_v49 = vadd.f32 %v3196_v39, %v1020_v11  ;;  %s3343_s9 = sld [smem:[#allocation9 + $0x8f]]  ;;  %s1981_s23 = smov [#allocation12]  }
 0x1f9   : > { %v1103_v41 = vmul.f32 %v1690_v40, %v1102_v38  ;;  %v1060_v24 = vsel %vm454_vm3, %v1058_v13, 0.0  ;;  %v1036_v9 = vadd.f32 %v3233_v37, %v1032_v59  ;;  %v1048_v45 = vadd.f32 %v3247_v3, %v1044_v54  ;;  %s3925_s24 = sld [smem:[#allocation26_spill]]  ;;  %s1809_s12 = sshll.u32 %s1981_s23, 4  ;;  %s1810_s12 = int_to_ptr.vmem [resolvable:$false] %s1809_s12 }
 0x1fa   : > { %v1071_v26 = vmul.f32 %v1070_v52, %v1060_v24  ;;  %v1083_v20 = vmul.f32 %v1082_v31, %v1060_v24  ;;  %v1016_v14 = vadd.f32 %v3256_v61, %v1012_v55  ;;  %v1028_v39 = vadd.f32 %v3258_v43, %v1024_v49  ;;  %s3927_s13 = sld [smem:[#allocation38_spill]]  ;;  %s1811_s3 = scalar_lea.vmem %s1810_s12, 1024 }
 0x1fb   : > { %v1095_v58 = vmul.f32 %v1094_v53, %v1060_v24  ;;  %v1107_v15 = vmul.f32 %v1106_v57, %v1060_v24  ;;  %v1040_v37 = vadd.f32 %v3264_v0, %v1036_v9  ;;  %v1052_v3 = vadd.f32 %v3266_v19, %v1048_v45  ;;  %s3930_s10 = sld [smem:[#allocation123_spill]] }
 0x1fc   : > { %v1119_v6 = vstv %s3288_s30  ;;  %v1131_v23 = vstv %s3292_s11  ;;  %v1064_v62 = vadd.f32 %v1063_v30, %v1016_v14  ;;  %v1076_v44 = vadd.f32 %v1075_v50, %v1028_v39 }
 0x1fd   : > { %v1143_v61 = vstv %s3298_s6  ;;  %v1155_v27 = vstv %s3304_s7  ;;  %v1088_v43 = vadd.f32 %v1087_v42, %v1040_v37  ;;  %v1100_v34 = vadd.f32 %v1099_v12, %v1052_v3  ;;  %s1521_s15 = sshll.u32 %s3924_s29, 3 }
 0x1fe   : > { %v1113_v35 = vsel %vm449_vm2, 0.0, %v1111_v28  ;;  %v1123_v8 = vstv %s3309_s27  ;;  %v1068_v0 = vadd.f32 %v1067_v21, %v1064_v62  ;;  %v1080_v19 = vadd.f32 %v1079_v4, %v1076_v44 }
 0x1ff   : > { %v1120_v7 = vmul.f32 %v1119_v6, %v1113_v35  ;;  %v1132_v56 = vmul.f32 %v1131_v23, %v1113_v35  ;;  %v1092_v60 = vadd.f32 %v1091_v2, %v1088_v43  ;;  %v1104_v51 = vadd.f32 %v1103_v41, %v1100_v34  ;;  %s1186_s2 = sadd.s32 %s3925_s24, %s1521_s15 }
 0x200   : > { %v1144_v30 = vmul.f32 %v1143_v61, %v1113_v35  ;;  %v1156_v50 = vmul.f32 %v1155_v27, %v1113_v35  ;;  %v1072_v47 = vadd.f32 %v1071_v26, %v1068_v0  ;;  %v1084_v22 = vadd.f32 %v1083_v20, %v1080_v19  ;;  %s3928_s5 = sshll.u32 %s3927_s13, 5  ;;  %s1522_s28 = sshll.u32 %s1186_s2, 7 }
 0x201   : > { %v1124_v18 = vmul.f32 %v1123_v8, %v3926_v63  ;;  %v1127_v42 = vstv %s3314_s20  ;;  %v1096_v12 = vadd.f32 %v1095_v58, %v1092_v60  ;;  %v1108_v17 = vadd.f32 %v1107_v15, %v1104_v51  ;;  %s387_s25 = scalar_lea.vmem [#allocation12], %s3928_s5  ;;  %s3368_s14 = scalar_lea.hbm %s3930_s10, %s1522_s28 }
 0x202   : > { %v1135_v25 = vstv %s3320_s4  ;;  %v1139_v16 = vstv %s3325_s0  ;;  %v1121_v40 = vadd.f32 %v1120_v7, %v1072_v47  ;;  %v1133_v21 = vadd.f32 %v1132_v56, %v1084_v22  ;;  %s1189_s8 = sshll.u32 %s387_s25, 4  ;;  %s1175_s17 = scalar_lea.sflag [#allocation4], %s3927_s13  ;;  %s3363_s8 = int_to_ptr.vmem [resolvable:$true] %s1189_s8 }
 0x203   : > { %v1136_v52 = vmul.f32 %v1135_v25, %v3926_v63  ;;  %v1147_v48 = vstv %s3329_s26  ;;  %v1145_v5 = vadd.f32 %v1144_v30, %v1096_v12  ;;  %v1157_v36 = vadd.f32 %v1156_v50, %v1108_v17  ;;  %s1805_s18 = scalar_lea.vmem %s3363_s8, 512  ;;  %p1812_p8 = scmp.lt.s32.totalorder %s3363_s8, %s1810_s12 }
 0x204   : > { %v1148_v31 = vmul.f32 %v1147_v48, %v3926_v63  ;;  %v1151_v29 = vstv %s3333_s22  ;;  %v1159_v33 = vstv %s3339_s21  ;;  %v1163_v4 = vstv %s3343_s9  ;;  %p1806_p10 = scmp.ne.s32.totalorder %s3363_s8, %s1805_s18  ;;  %p1813_p13 = scmp.lt.s32.totalorder %s1811_s3, %s1805_s18 }
 0x205   : > { %v1117_v1 = vsel %vm454_vm3, %v1115_v10, 0.0  ;;  %v1125_v13 = vadd.f32 %v1124_v18, %v1121_v40  ;;  %v1160_v32 = vmul.f32 %v1159_v33, %v3926_v63  ;;  %v1137_v2 = vadd.f32 %v1136_v52, %v1133_v21 }
 0x206   : > { %v1128_v11 = vmul.f32 %v1127_v42, %v1117_v1  ;;  %v1140_v53 = vmul.f32 %v1139_v16, %v1117_v1  ;;  %v1149_v59 = vadd.f32 %v1148_v31, %v1145_v5  ;;  %v1152_v54 = vmul.f32 %v1151_v29, %v1117_v1  ;;  %p1807_p5 = pnand %p1806_p10, %p2242_p4  ;;  %p1814_p9 = por %p1813_p13, %p1812_p8 }
 0x207   : > { %v1164_v38 = vmul.f32 %v1163_v4, %v1117_v1  ;;  %v1161_v55 = vadd.f32 %v1160_v32, %v1157_v36 }
 0x208   : > { %v1129_v57 = vadd.f32 %v1128_v11, %v1125_v13  ;;  %v1141_v46 = vadd.f32 %v1140_v53, %v1137_v2  ;;  %v1153_v49 = vadd.f32 %v1152_v54, %v1149_v59  ;;  %p1808_p12 = pneg %p1807_p5 }
 0x209   : > { %v1165_v41 = vadd.f32 %v1164_v38, %v1161_v55 }
 0x20a   : > { %1167 = vst.msk [vmem:[%s387_s25] sm:$0xff] %vm1166_vm4, %v1129_v57  ;;  %1517 = vst.msk [vmem:[%s387_s25 + $0x8] sm:$0xff] %vm1166_vm4, %v1141_v46  ;;  %p1815_p7 = pnand %p1814_p9, %p1808_p12 }
 0x20b   : > { %1518 = vst.msk [vmem:[%s387_s25 + $0x10] sm:$0xff] %vm1166_vm4, %v1153_v49  ;;  %1519 = vst.msk [vmem:[%s387_s25 + $0x18] sm:$0xff] %vm1166_vm4, %v1165_v41 }
 0x20c   : > { %1818 = shalt.err (!%p1815_p7)
}
 0x20d   : > { %s1819_s30 = scalar_lea.hbm %s3368_s14, 512  ;;  %s1823_s7 = scalar_lea.hbm %s3930_s10, 2048 }
 0x20e   : > { %p1820_p1 = scmp.ne.s32.totalorder %s3368_s14, %s1819_s30  ;;  %p1824_p11 = scmp.lt.s32.totalorder %s3368_s14, %s3930_s10 }
 0x20f   : > { %p1825_p6 = scmp.lt.s32.totalorder %s1823_s7, %s1819_s30 }
 0x210   : > { %p1821_p2 = pnand %p1820_p1, %p2242_p4 }
 0x211   : > { %p1826_p0 = por %p1825_p6, %p1824_p11 }
 0x212   : > { %p1822_p3 = pneg %p1821_p2 }
 0x214   : > { %p1827_p10 = pnand %p1826_p0, %p1822_p3 }
 0x216   : > { %1830 = shalt.err (!%p1827_p10)
}
 0x217   : > { %s1982_s4 = smov 128   ;;  %s1983_s0 = smov 256  }
 0x218   : > { %s1984_s26 = smov 8  }
 0x219   : > { %1539 = dma.vmem_to_hbm [thread:$0]  (%p2242_p4), %s3363_s8, 512, %s3368_s14, %s1175_s17, %s1982_s4, %s1983_s0, %s1984_s26  }
 0x21a PF: > { %s3931_s22 = sld [smem:[#allocation30_spill]] }
 0x21b   : > { %s3932_s21 = sld [smem:[#allocation23_spill]] }
 0x21c   : > { %s3933_s29 = sld [smem:[#allocation34_spill]] }
 0x220   : > { %p1567_p5 = scmp.ge.s32.totalorder %s3931_s22, 2 }
 0x221   : > { %s1204_s9 = sand.u32 1, %s3932_s21  }
 0x222   : > { %p3934_p12 = scmp.ne.s32.totalorder %s3933_s29, 0  ;;  %s1205_s24 = scalar_lea.sflag [#allocation4], %s1204_s9 }
 0x224   : > { %p1559_p8 = pnand %p1567_p5, %p3934_p12 }
 0x226   : > { %p1560_p13 = pneg %p1559_p8 }
 0x228   : > { %1908 = dma.done.wait (%p1560_p13), %s1205_s24, 512  }
 0x229   : > { %1910 = vsyncadd (%p1560_p13), %s1205_s24, 4294966784  ;;  %s26_s6 = sadd.s32 1, %s3931_s22   ;;  %s3936_s18 = sld [smem:[#allocation19_spill]] }
 0x22a   : > { %p3398_p9 = scmp.ge.s32.totalorder %s26_s6, 6   ;;  %s3937_s19 = sld [smem:[#allocation20_spill]] }
 0x22b   : > { %s3938_s20 = sld [smem:[#allocation37_spill]] }
 0x22c   : > { %s3939_s21 = sld [smem:[#allocation21_spill]] }
 0x22d   : > { %s3940_s22 = sld [smem:[#allocation22_spill]] }
 0x22e   : > { %s3941_s23 = sld [smem:[#allocation33_spill]] }
 0x22f   : > { %s3942_s24 = sld [smem:[#allocation24_spill]] }
 0x230   : > { %s3943_s25 = sld [smem:[#allocation25_spill]] }
 0x231   : > { %s3944_s26 = sld [smem:[#allocation35_spill]]  ;;  %25 = sbr.rel (!%p3398_p9) target bundleno = 21 (0x15), region = 121 }
 0x232   : > { %s3945_s27 = sld [smem:[#allocation28_spill]] }
 0x233   : > { %s3946_s28 = sld [smem:[#allocation29_spill]] }
 0x234   : > { %s3947_s29 = sld [smem:[#allocation31_spill]] }
 0x235   : > { %s3948_s30 = sld [smem:[#allocation32_spill]] }
 0x236   :  { %1210 = vsyncpa [#allocation3], 1 }
 0x237   :  { %1212 = vsyncpa [#allocation3 + $0x1], 1 }
 0x238   :  { %1213 = vsyncpa [#allocation7], 1 }
 0x239   :  { %1215 = vsyncpa [#allocation7 + $0x1], 1 }
 0x23a   :  { %1216 = vsyncpa [#allocation4], 1 }
 0x23b   :  { %1218 = vsyncpa [#allocation4 + $0x1], 1 }
 0x23c   :  { %1219 = vsyncpa [#allocation5], 1 }
 0x23d   :  { %1221 = vsyncpa [#allocation5 + $0x1], 1 }
 0x23e   :  { %1222 = vsyncpa [#allocation11], 1 }

</bundles_post_ra>
